<compile_context>
chip_gen: v7x
topology: tpu7x:2x2x1
jax: 0.10.0
libtpu: 0.0.40
codegen_flags: <defaults>
</compile_context>

<pallas_src>
import jax
import jax.numpy as jnp
from jax import lax
from jax.experimental import pallas as pl
from jax.experimental.pallas import tpu as pltpu

_LANE = 128
_SUBLANE = 8
# Conservative per-chunk VMEM budget: fits comfortably under v7x's 32 MiB scoped
# default / 64 MiB physical (v5e/v6e have 128 MiB physical).
_VMEM_BUDGET_BYTES = 24 * 1024 * 1024


def _round_up(x, m):
    return (x + m - 1) // m * m


def _make_lstm_head_kernel(T, Tc, Bp, Hp, unroll):
    """Kernel factory. Grid axis 0 iterates over chunks of Tc timesteps."""
    n_chunks = pl.cdiv(T, Tc)
    masked_tail = (n_chunks * Tc != T)   # static: only emit masking when needed

    def kernel(x_ref, wih_ref, whh_ref, b_ref, w2_ref, b2_ref,
               out_ref, xp_scr, h_scr, c_scr):
        chunk = pl.program_id(0)

        @pl.when(chunk == 0)
        def _():
            h_scr[...] = jnp.zeros_like(h_scr)
            c_scr[...] = jnp.zeros_like(c_scr)

        # ---- prepass: x @ W_ih^T (+ bias) for all Tc timesteps of this chunk,
        # one MXU matmul. Stored (Tc, Bp, 4*Hp) for leading-axis loop indexing.
        xp_scr[...] = (
            jnp.dot(x_ref[...], wih_ref[...],
                    preferred_element_type=jnp.float32)
            + b_ref[...]
        ).reshape(Tc, Bp, 4 * Hp)

        # Hoist the recurrent weight read once: resident across the time loop.
        whh = whh_ref[...]

        def step(t, carry):
            h, c = carry
            gates = xp_scr[t] + jnp.dot(
                h, whh, preferred_element_type=jnp.float32)     # (Bp, 4*Hp)
            # PyTorch gate order [i, f, g, o]; each block lane-aligned (Hp % 128 == 0)
            i_g = jax.nn.sigmoid(gates[:, 0 * Hp:1 * Hp])
            f_g = jax.nn.sigmoid(gates[:, 1 * Hp:2 * Hp])
            g_g = jnp.tanh(gates[:, 2 * Hp:3 * Hp])
            o_g = jax.nn.sigmoid(gates[:, 3 * Hp:4 * Hp])
            c_new = f_g * c + i_g * g_g
            h_new = o_g * jnp.tanh(c_new)
            if masked_tail:
                # Padded (zero) timesteps past the real T must not advance state.
                valid = (chunk * Tc + t) < T
                h_new = jnp.where(valid, h_new, h)
                c_new = jnp.where(valid, c_new, c)
            return h_new, c_new

        h_fin, c_fin = lax.fori_loop(0, Tc, step, (h_scr[...], c_scr[...]),
                                     unroll=unroll)
        h_scr[...] = h_fin
        c_scr[...] = c_fin

        # ---- head on the LAST chunk: Linear + numerically-stable LogSoftmax
        @pl.when(chunk == n_chunks - 1)
        def _():
            logits = (jnp.dot(h_fin, w2_ref[...],
                              preferred_element_type=jnp.float32)
                      + b2_ref[...])                             # (Bp, C)
            m = jnp.max(logits, axis=1, keepdims=True)
            shifted = logits - m
            lse = jnp.log(jnp.sum(jnp.exp(shifted), axis=1, keepdims=True))
            out_ref[...] = (shifted - lse).astype(out_ref.dtype)

    return kernel


def prepare_params(w_ih, w_hh, b_ih, b_hh, w2, b2):
    """Pad/transpose the PyTorch-layout params ONCE (hoisted out of the forward).

    Per-gate blocks are padded H -> Hp = roundup(H, 128) so gate slices are
    lane-aligned inside the kernel; padded lanes are zero-filled so they stay
    exactly 0 through the recurrence.
    """
    f32 = jnp.float32
    H = w_hh.shape[1]
    D = w_ih.shape[1]
    C = w2.shape[0]
    Hp = _round_up(H, _LANE)

    # W_ih^T with per-gate column blocks padded H -> Hp.
    wih_p = jnp.pad(jnp.transpose(w_ih.astype(f32).reshape(4, H, D), (0, 2, 1)),
                    ((0, 0), (0, 0), (0, Hp - H)))                  # (4, D, Hp)
    wih_p = jnp.transpose(wih_p, (1, 0, 2)).reshape(D, 4 * Hp)      # (D, 4*Hp)

    # W_hh^T padded on both the input-h rows and per-gate output columns.
    whh_p = jnp.pad(jnp.transpose(w_hh.astype(f32).reshape(4, H, H), (0, 2, 1)),
                    ((0, 0), (0, Hp - H), (0, Hp - H)))             # (4, Hp, Hp)
    whh_p = jnp.transpose(whh_p, (1, 0, 2)).reshape(Hp, 4 * Hp)     # (Hp, 4*Hp)

    b_p = jnp.pad((b_ih + b_hh).astype(f32).reshape(4, H),
                  ((0, 0), (0, Hp - H))).reshape(1, 4 * Hp)         # (1, 4*Hp)

    w2_p = jnp.pad(jnp.transpose(w2.astype(f32)), ((0, Hp - H), (0, 0)))  # (Hp, C)
    b2_r = b2.astype(f32).reshape(1, C)                             # (1, C)
    return wih_p, whh_p, b_p, w2_p, b2_r


def lstm_forward(x_btd, prepared, *, max_chunk_timesteps=None):
    """x_btd: (B, T, D_in) float32, PyTorch batch_first layout.

    Returns (B, num_classes) log-probabilities — same semantics as the PyTorch
    module forward (h_n -> Linear -> LogSoftmax).
    """
    wih_p, whh_p, b_p, w2_p, b2_r = prepared
    f32 = jnp.float32

    B, T, D = x_btd.shape
    Hp = whh_p.shape[0]
    C = b2_r.shape[1]
    Bp = _round_up(B, _SUBLANE)          # f32 sublane count
    Dp = _round_up(D, _LANE)             # lane-padded footprint of x in VMEM
    Cp = _round_up(C, _LANE)

    # ---- VMEM-budget-aware chunking of the time axis (scale-up path) ----
    fixed_bytes = 4 * (
        2 * (Dp * 4 * Hp + Hp * 4 * Hp + _SUBLANE * 4 * Hp
             + Hp * Cp + _SUBLANE * Cp)          # weights (x2 buffering slack)
        + Bp * Cp                                # output block
        + 2 * Bp * Hp)                           # h/c scratch
    per_t_bytes = 4 * (2 * Bp * Dp + Bp * 4 * Hp)   # x chunk (double-buffered) + xp scratch
    Tc = max(1, min(T, (_VMEM_BUDGET_BYTES - fixed_bytes) // per_t_bytes))
    if max_chunk_timesteps is not None:
        Tc = max(1, min(Tc, max_chunk_timesteps))
    n_chunks = pl.cdiv(T, Tc)
    T_pad = n_chunks * Tc
    vmem_limit = max(int(1.25 * (fixed_bytes + Tc * per_t_bytes)) + (1 << 20),
                     8 * 1024 * 1024)

    # ---- x: pad batch, go time-major, pad time, flatten (fused XLA pre-op).
    # Padded timesteps are zeros and are masked out of the recurrence in-kernel.
    x_p = jnp.pad(x_btd.astype(f32), ((0, Bp - B), (0, 0), (0, 0)))    # (Bp, T, D)
    x_tbd = jnp.transpose(x_p, (1, 0, 2))                              # (T, Bp, D)
    x_tbd = jnp.pad(x_tbd, ((0, T_pad - T), (0, 0), (0, 0)))           # (T_pad, Bp, D)
    x_flat = x_tbd.reshape(T_pad * Bp, D)                              # (T_pad*Bp, D)

    unroll = min(Tc, 8)
    const2d = lambda shape: pl.BlockSpec(shape, lambda c: (0, 0))      # whole array, resident

    out = pl.pallas_call(
        _make_lstm_head_kernel(T, Tc, Bp, Hp, unroll),
        out_shape=jax.ShapeDtypeStruct((Bp, C), f32),
        grid_spec=pltpu.PrefetchScalarGridSpec(
            num_scalar_prefetch=0,
            grid=(n_chunks,),
            in_specs=[
                pl.BlockSpec((Tc * Bp, D), lambda c: (c, 0)),          # streamed x chunks
                const2d(wih_p.shape),
                const2d(whh_p.shape),
                const2d(b_p.shape),
                const2d(w2_p.shape),
                const2d(b2_r.shape),
            ],
            out_specs=pl.BlockSpec((Bp, C), lambda c: (0, 0)),
            scratch_shapes=[
                pltpu.VMEM((Tc, Bp, 4 * Hp), f32),                     # x-projection prepass
                pltpu.VMEM((Bp, Hp), f32),                             # h carry
                pltpu.VMEM((Bp, Hp), f32),                             # c carry
            ]),
        compiler_params=pltpu.CompilerParams(
            dimension_semantics=("arbitrary",),
            vmem_limit_bytes=vmem_limit),
    )(x_flat, wih_p, whh_p, b_p, w2_p, b2_r)

    return out[:B]


def rnn_forward_ref(x_btd, w_ih, w_hh, b_ih, b_hh, w2, b2):
    """Pure-JAX reference of the same forward pass (for verification)."""
    B, T, D = x_btd.shape
    H = w_hh.shape[1]
    h = jnp.zeros((B, H), jnp.float32)
    c = jnp.zeros((B, H), jnp.float32)
    for t in range(T):
        g = x_btd[:, t, :] @ w_ih.T + h @ w_hh.T + b_ih + b_hh
        i = jax.nn.sigmoid(g[:, 0 * H:1 * H])
        f = jax.nn.sigmoid(g[:, 1 * H:2 * H])
        gg = jnp.tanh(g[:, 2 * H:3 * H])
        o = jax.nn.sigmoid(g[:, 3 * H:4 * H])
        c = f * c + i * gg
        h = o * jnp.tanh(c)
    logits = h @ w2.T + b2
    return jax.nn.log_softmax(logits, axis=1)


if __name__ == "__main__":
    # Small shapes consistent with the module's forward: x is (B, T, in_features)
    B, T, D_in, H, C = 2, 8, 8, 32, 16

    key = jax.random.PRNGKey(0)
    keys = jax.random.split(key, 8)
    scale = 1.0 / jnp.sqrt(jnp.float32(H))

    x = jax.random.normal(keys[0], (B, T, D_in), jnp.float32)
    w_ih = jax.random.uniform(keys[1], (4 * H, D_in), jnp.float32, -scale, scale)
    w_hh = jax.random.uniform(keys[2], (4 * H, H), jnp.float32, -scale, scale)
    b_ih = jax.random.uniform(keys[3], (4 * H,), jnp.float32, -scale, scale)
    b_hh = jax.random.uniform(keys[4], (4 * H,), jnp.float32, -scale, scale)
    w2 = jax.random.uniform(keys[5], (C, H), jnp.float32, -scale, scale)
    b2 = jax.random.uniform(keys[6], (C,), jnp.float32, -scale, scale)

    # Weight prep hoisted out of the forward (done once per parameter set).
    prepared = prepare_params(w_ih, w_hh, b_ih, b_hh, w2, b2)
    fwd = jax.jit(lstm_forward, static_argnames=("max_chunk_timesteps",))

    ref = rnn_forward_ref(x, w_ih, w_hh, b_ih, b_hh, w2, b2)

    # Default path: whole T fits in one chunk (single grid step).
    out = jax.block_until_ready(fwd(x, prepared))
    assert out.shape == (B, C)
    assert jnp.allclose(out, ref, atol=1e-5, rtol=1e-5), (
        f"single-chunk max abs err {jnp.max(jnp.abs(out - ref))}")

    # Scale-up path: force T-chunking (3 chunks of 3 timesteps, masked tail) to
    # exercise the grid / h-c-carry / tail-mask machinery.
    out_chunked = jax.block_until_ready(fwd(x, prepared, max_chunk_timesteps=3))
    assert jnp.allclose(out_chunked, ref, atol=1e-5, rtol=1e-5), (
        f"chunked max abs err {jnp.max(jnp.abs(out_chunked - ref))}")

    print("KERNEL_OK")
</pallas_src>

<mosaic_0001>
module attributes {stable_mosaic.version = 11 : i64} {
  func.func @kernel(%arg0: i32, %arg1: memref<64x8xf32, #tpu.memory_space<vmem>>, %arg2: memref<8x512xf32, #tpu.memory_space<vmem>>, %arg3: memref<128x512xf32, #tpu.memory_space<vmem>>, %arg4: memref<1x512xf32, #tpu.memory_space<vmem>>, %arg5: memref<128x16xf32, #tpu.memory_space<vmem>>, %arg6: memref<1x16xf32, #tpu.memory_space<vmem>>, %arg7: memref<8x16xf32, #tpu.memory_space<vmem>>, %arg8: memref<8x8x512xf32, #tpu.memory_space<vmem>>, %arg9: memref<8x128xf32, #tpu.memory_space<vmem>>, %arg10: memref<8x128xf32, #tpu.memory_space<vmem>>) attributes {dimension_semantics = [#tpu.dimension_semantics<arbitrary>], iteration_bounds = array<i64: 1>, scalar_prefetch = 0 : i64, scratch_operands = 3 : i64, tpu.core_type = #tpu.core_type<tc>, window_params = [{transform_indices = @transform_0, window_bounds = array<i64: 64, 8>}, {pipeline_mode = #tpu.pipeline_mode<synchronous>, transform_indices = @transform_1, window_bounds = array<i64: 8, 512>}, {pipeline_mode = #tpu.pipeline_mode<synchronous>, transform_indices = @transform_2, window_bounds = array<i64: 128, 512>}, {pipeline_mode = #tpu.pipeline_mode<synchronous>, transform_indices = @transform_3, window_bounds = array<i64: 1, 512>}, {pipeline_mode = #tpu.pipeline_mode<synchronous>, transform_indices = @transform_4, window_bounds = array<i64: 128, 16>}, {pipeline_mode = #tpu.pipeline_mode<synchronous>, transform_indices = @transform_5, window_bounds = array<i64: 1, 16>}, {pipeline_mode = #tpu.pipeline_mode<synchronous>, transform_indices = @transform_6, window_bounds = array<i64: 8, 16>}]} {
    %c0_i32 = arith.constant 0 : i32
    %0 = arith.cmpi eq, %arg0, %c0_i32 : i32
    %1 = arith.extui %0 : i1 to i32
    %c0_i32_0 = arith.constant 0 : i32
    %2 = arith.cmpi ne, %1, %c0_i32_0 : i32
    scf.if %2 {
      %cst_70 = arith.constant 0.000000e+00 : f32
      %259 = vector.broadcast %cst_70 : f32 to vector<8x128xf32>
      %c0_71 = arith.constant 0 : index
      %c0_72 = arith.constant 0 : index
      %260 = vector.load %arg9[%c0_71, %c0_72] : memref<8x128xf32, #tpu.memory_space<vmem>>, vector<8x128xf32>
      tpu.vector_store %arg9[%c0_71, %c0_72], %259 {strides = array<i32>} : memref<8x128xf32, #tpu.memory_space<vmem>>, vector<8x128xf32>,
      %cst_73 = arith.constant 0.000000e+00 : f32
      %261 = vector.broadcast %cst_73 : f32 to vector<8x128xf32>
      %c0_74 = arith.constant 0 : index
      %c0_75 = arith.constant 0 : index
      %262 = vector.load %arg10[%c0_74, %c0_75] : memref<8x128xf32, #tpu.memory_space<vmem>>, vector<8x128xf32>
      tpu.vector_store %arg10[%c0_74, %c0_75], %261 {strides = array<i32>} : memref<8x128xf32, #tpu.memory_space<vmem>>, vector<8x128xf32>,
    } else {
    }
    %c0 = arith.constant 0 : index
    %c0_1 = arith.constant 0 : index
    %3 = vector.load %arg1[%c0, %c0_1] : memref<64x8xf32, #tpu.memory_space<vmem>>, vector<64x8xf32>
    %c0_2 = arith.constant 0 : index
    %c0_3 = arith.constant 0 : index
    %4 = vector.load %arg2[%c0_2, %c0_3] : memref<8x512xf32, #tpu.memory_space<vmem>>, vector<8x512xf32>
    %cst = arith.constant dense<0.000000e+00> : vector<64x512xf32>
    %5 = tpu.matmul %3, %4, %cst {dimension_numbers = #tpu.dot_dimension_numbers<[1], [0], [0], [1], [0, 0, 1, 1], [], []>} : vector<64x8xf32>, vector<8x512xf32>, vector<64x512xf32> -> vector<64x512xf32>
    %c0_4 = arith.constant 0 : index
    %c0_5 = arith.constant 0 : index
    %6 = vector.load %arg4[%c0_4, %c0_5] : memref<1x512xf32, #tpu.memory_space<vmem>>, vector<1x512xf32>
    %7 = vector.broadcast %6 : vector<1x512xf32> to vector<64x512xf32>
    %8 = arith.addf %5, %7 : vector<64x512xf32>
    %9 = vector.shape_cast %8 : vector<64x512xf32> to vector<8x8x512xf32>
    %c0_6 = arith.constant 0 : index
    %c0_7 = arith.constant 0 : index
    %c0_8 = arith.constant 0 : index
    %10 = vector.load %arg8[%c0_6, %c0_7, %c0_8] : memref<8x8x512xf32, #tpu.memory_space<vmem>>, vector<8x8x512xf32>
    tpu.vector_store %arg8[%c0_6, %c0_7, %c0_8], %9 {strides = array<i32>} : memref<8x8x512xf32, #tpu.memory_space<vmem>>, vector<8x8x512xf32>,
    %c0_9 = arith.constant 0 : index
    %c0_10 = arith.constant 0 : index
    %11 = vector.load %arg3[%c0_9, %c0_10] : memref<128x512xf32, #tpu.memory_space<vmem>>, vector<128x512xf32>
    %c0_11 = arith.constant 0 : index
    %c0_12 = arith.constant 0 : index
    %12 = vector.load %arg9[%c0_11, %c0_12] : memref<8x128xf32, #tpu.memory_space<vmem>>, vector<8x128xf32>
    %c0_13 = arith.constant 0 : index
    %c0_14 = arith.constant 0 : index
    %13 = vector.load %arg10[%c0_13, %c0_14] : memref<8x128xf32, #tpu.memory_space<vmem>>, vector<8x128xf32>
    %c0_i32_15 = arith.constant 0 : i32
    %14 = arith.index_cast %c0_i32_15 : i32 to index
    %c0_16 = arith.constant 0 : index
    %c0_17 = arith.constant 0 : index
    %15 = vector.load %arg8[%14, %c0_16, %c0_17] : memref<8x8x512xf32, #tpu.memory_space<vmem>>, vector<1x8x512xf32>
    %16 = vector.shape_cast %15 : vector<1x8x512xf32> to vector<8x512xf32>
    %cst_18 = arith.constant dense<0.000000e+00> : vector<8x512xf32>
    %17 = tpu.matmul %12, %11, %cst_18 {dimension_numbers = #tpu.dot_dimension_numbers<[1], [0], [0], [1], [0, 0, 1, 1], [], []>} : vector<8x128xf32>, vector<128x512xf32>, vector<8x512xf32> -> vector<8x512xf32>
    %18 = arith.addf %16, %17 : vector<8x512xf32>
    %19 = vector.extract_strided_slice %18 {offsets = [0, 0], sizes = [8, 128], strides = [1, 1]} : vector<8x512xf32> to vector<8x128xf32>
    %20 = arith.negf %19 : vector<8x128xf32>
    %21 = math.exp %20 : vector<8x128xf32>
    %cst_19 = arith.constant 1.000000e+00 : f32
    %22 = vector.broadcast %cst_19 : f32 to vector<8x128xf32>
    %23 = arith.addf %22, %21 : vector<8x128xf32>
    %24 = arith.divf %22, %23 : vector<8x128xf32>
    %25 = vector.extract_strided_slice %18 {offsets = [0, 128], sizes = [8, 128], strides = [1, 1]} : vector<8x512xf32> to vector<8x128xf32>
    %26 = arith.negf %25 : vector<8x128xf32>
    %27 = math.exp %26 : vector<8x128xf32>
    %cst_20 = arith.constant 1.000000e+00 : f32
    %28 = vector.broadcast %cst_20 : f32 to vector<8x128xf32>
    %29 = arith.addf %28, %27 : vector<8x128xf32>
    %30 = arith.divf %28, %29 : vector<8x128xf32>
    %31 = vector.extract_strided_slice %18 {offsets = [0, 256], sizes = [8, 128], strides = [1, 1]} : vector<8x512xf32> to vector<8x128xf32>
    %32 = math.tanh %31 : vector<8x128xf32>
    %33 = vector.extract_strided_slice %18 {offsets = [0, 384], sizes = [8, 128], strides = [1, 1]} : vector<8x512xf32> to vector<8x128xf32>
    %34 = arith.negf %33 : vector<8x128xf32>
    %35 = math.exp %34 : vector<8x128xf32>
    %cst_21 = arith.constant 1.000000e+00 : f32
    %36 = vector.broadcast %cst_21 : f32 to vector<8x128xf32>
    %37 = arith.addf %36, %35 : vector<8x128xf32>
    %38 = arith.divf %36, %37 : vector<8x128xf32>
    %39 = arith.mulf %30, %13 : vector<8x128xf32>
    %40 = arith.mulf %24, %32 : vector<8x128xf32>
    %41 = arith.addf %39, %40 : vector<8x128xf32>
    %42 = math.tanh %41 : vector<8x128xf32>
    %43 = arith.mulf %38, %42 : vector<8x128xf32>
    %c1_i32 = arith.constant 1 : i32
    %44 = arith.index_cast %c1_i32 : i32 to index
    %c0_22 = arith.constant 0 : index
    %c0_23 = arith.constant 0 : index
    %45 = vector.load %arg8[%44, %c0_22, %c0_23] : memref<8x8x512xf32, #tpu.memory_space<vmem>>, vector<1x8x512xf32>
    %46 = vector.shape_cast %45 : vector<1x8x512xf32> to vector<8x512xf32>
    %cst_24 = arith.constant dense<0.000000e+00> : vector<8x512xf32>
    %47 = tpu.matmul %43, %11, %cst_24 {dimension_numbers = #tpu.dot_dimension_numbers<[1], [0], [0], [1], [0, 0, 1, 1], [], []>} : vector<8x128xf32>, vector<128x512xf32>, vector<8x512xf32> -> vector<8x512xf32>
    %48 = arith.addf %46, %47 : vector<8x512xf32>
    %49 = vector.extract_strided_slice %48 {offsets = [0, 0], sizes = [8, 128], strides = [1, 1]} : vector<8x512xf32> to vector<8x128xf32>
    %50 = arith.negf %49 : vector<8x128xf32>
    %51 = math.exp %50 : vector<8x128xf32>
    %cst_25 = arith.constant 1.000000e+00 : f32
    %52 = vector.broadcast %cst_25 : f32 to vector<8x128xf32>
    %53 = arith.addf %52, %51 : vector<8x128xf32>
    %54 = arith.divf %52, %53 : vector<8x128xf32>
    %55 = vector.extract_strided_slice %48 {offsets = [0, 128], sizes = [8, 128], strides = [1, 1]} : vector<8x512xf32> to vector<8x128xf32>
    %56 = arith.negf %55 : vector<8x128xf32>
    %57 = math.exp %56 : vector<8x128xf32>
    %cst_26 = arith.constant 1.000000e+00 : f32
    %58 = vector.broadcast %cst_26 : f32 to vector<8x128xf32>
    %59 = arith.addf %58, %57 : vector<8x128xf32>
    %60 = arith.divf %58, %59 : vector<8x128xf32>
    %61 = vector.extract_strided_slice %48 {offsets = [0, 256], sizes = [8, 128], strides = [1, 1]} : vector<8x512xf32> to vector<8x128xf32>
    %62 = math.tanh %61 : vector<8x128xf32>
    %63 = vector.extract_strided_slice %48 {offsets = [0, 384], sizes = [8, 128], strides = [1, 1]} : vector<8x512xf32> to vector<8x128xf32>
    %64 = arith.negf %63 : vector<8x128xf32>
    %65 = math.exp %64 : vector<8x128xf32>
    %cst_27 = arith.constant 1.000000e+00 : f32
    %66 = vector.broadcast %cst_27 : f32 to vector<8x128xf32>
    %67 = arith.addf %66, %65 : vector<8x128xf32>
    %68 = arith.divf %66, %67 : vector<8x128xf32>
    %69 = arith.mulf %60, %41 : vector<8x128xf32>
    %70 = arith.mulf %54, %62 : vector<8x128xf32>
    %71 = arith.addf %69, %70 : vector<8x128xf32>
    %72 = math.tanh %71 : vector<8x128xf32>
    %73 = arith.mulf %68, %72 : vector<8x128xf32>
    %c2_i32 = arith.constant 2 : i32
    %74 = arith.index_cast %c2_i32 : i32 to index
    %c0_28 = arith.constant 0 : index
    %c0_29 = arith.constant 0 : index
    %75 = vector.load %arg8[%74, %c0_28, %c0_29] : memref<8x8x512xf32, #tpu.memory_space<vmem>>, vector<1x8x512xf32>
    %76 = vector.shape_cast %75 : vector<1x8x512xf32> to vector<8x512xf32>
    %cst_30 = arith.constant dense<0.000000e+00> : vector<8x512xf32>
    %77 = tpu.matmul %73, %11, %cst_30 {dimension_numbers = #tpu.dot_dimension_numbers<[1], [0], [0], [1], [0, 0, 1, 1], [], []>} : vector<8x128xf32>, vector<128x512xf32>, vector<8x512xf32> -> vector<8x512xf32>
    %78 = arith.addf %76, %77 : vector<8x512xf32>
    %79 = vector.extract_strided_slice %78 {offsets = [0, 0], sizes = [8, 128], strides = [1, 1]} : vector<8x512xf32> to vector<8x128xf32>
    %80 = arith.negf %79 : vector<8x128xf32>
    %81 = math.exp %80 : vector<8x128xf32>
    %cst_31 = arith.constant 1.000000e+00 : f32
    %82 = vector.broadcast %cst_31 : f32 to vector<8x128xf32>
    %83 = arith.addf %82, %81 : vector<8x128xf32>
    %84 = arith.divf %82, %83 : vector<8x128xf32>
    %85 = vector.extract_strided_slice %78 {offsets = [0, 128], sizes = [8, 128], strides = [1, 1]} : vector<8x512xf32> to vector<8x128xf32>
    %86 = arith.negf %85 : vector<8x128xf32>
    %87 = math.exp %86 : vector<8x128xf32>
    %cst_32 = arith.constant 1.000000e+00 : f32
    %88 = vector.broadcast %cst_32 : f32 to vector<8x128xf32>
    %89 = arith.addf %88, %87 : vector<8x128xf32>
    %90 = arith.divf %88, %89 : vector<8x128xf32>
    %91 = vector.extract_strided_slice %78 {offsets = [0, 256], sizes = [8, 128], strides = [1, 1]} : vector<8x512xf32> to vector<8x128xf32>
    %92 = math.tanh %91 : vector<8x128xf32>
    %93 = vector.extract_strided_slice %78 {offsets = [0, 384], sizes = [8, 128], strides = [1, 1]} : vector<8x512xf32> to vector<8x128xf32>
    %94 = arith.negf %93 : vector<8x128xf32>
    %95 = math.exp %94 : vector<8x128xf32>
    %cst_33 = arith.constant 1.000000e+00 : f32
    %96 = vector.broadcast %cst_33 : f32 to vector<8x128xf32>
    %97 = arith.addf %96, %95 : vector<8x128xf32>
    %98 = arith.divf %96, %97 : vector<8x128xf32>
    %99 = arith.mulf %90, %71 : vector<8x128xf32>
    %100 = arith.mulf %84, %92 : vector<8x128xf32>
    %101 = arith.addf %99, %100 : vector<8x128xf32>
    %102 = math.tanh %101 : vector<8x128xf32>
    %103 = arith.mulf %98, %102 : vector<8x128xf32>
    %c3_i32 = arith.constant 3 : i32
    %104 = arith.index_cast %c3_i32 : i32 to index
    %c0_34 = arith.constant 0 : index
    %c0_35 = arith.constant 0 : index
    %105 = vector.load %arg8[%104, %c0_34, %c0_35] : memref<8x8x512xf32, #tpu.memory_space<vmem>>, vector<1x8x512xf32>
    %106 = vector.shape_cast %105 : vector<1x8x512xf32> to vector<8x512xf32>
    %cst_36 = arith.constant dense<0.000000e+00> : vector<8x512xf32>
    %107 = tpu.matmul %103, %11, %cst_36 {dimension_numbers = #tpu.dot_dimension_numbers<[1], [0], [0], [1], [0, 0, 1, 1], [], []>} : vector<8x128xf32>, vector<128x512xf32>, vector<8x512xf32> -> vector<8x512xf32>
    %108 = arith.addf %106, %107 : vector<8x512xf32>
    %109 = vector.extract_strided_slice %108 {offsets = [0, 0], sizes = [8, 128], strides = [1, 1]} : vector<8x512xf32> to vector<8x128xf32>
    %110 = arith.negf %109 : vector<8x128xf32>
    %111 = math.exp %110 : vector<8x128xf32>
    %cst_37 = arith.constant 1.000000e+00 : f32
    %112 = vector.broadcast %cst_37 : f32 to vector<8x128xf32>
    %113 = arith.addf %112, %111 : vector<8x128xf32>
    %114 = arith.divf %112, %113 : vector<8x128xf32>
    %115 = vector.extract_strided_slice %108 {offsets = [0, 128], sizes = [8, 128], strides = [1, 1]} : vector<8x512xf32> to vector<8x128xf32>
    %116 = arith.negf %115 : vector<8x128xf32>
    %117 = math.exp %116 : vector<8x128xf32>
    %cst_38 = arith.constant 1.000000e+00 : f32
    %118 = vector.broadcast %cst_38 : f32 to vector<8x128xf32>
    %119 = arith.addf %118, %117 : vector<8x128xf32>
    %120 = arith.divf %118, %119 : vector<8x128xf32>
    %121 = vector.extract_strided_slice %108 {offsets = [0, 256], sizes = [8, 128], strides = [1, 1]} : vector<8x512xf32> to vector<8x128xf32>
    %122 = math.tanh %121 : vector<8x128xf32>
    %123 = vector.extract_strided_slice %108 {offsets = [0, 384], sizes = [8, 128], strides = [1, 1]} : vector<8x512xf32> to vector<8x128xf32>
    %124 = arith.negf %123 : vector<8x128xf32>
    %125 = math.exp %124 : vector<8x128xf32>
    %cst_39 = arith.constant 1.000000e+00 : f32
    %126 = vector.broadcast %cst_39 : f32 to vector<8x128xf32>
    %127 = arith.addf %126, %125 : vector<8x128xf32>
    %128 = arith.divf %126, %127 : vector<8x128xf32>
    %129 = arith.mulf %120, %101 : vector<8x128xf32>
    %130 = arith.mulf %114, %122 : vector<8x128xf32>
    %131 = arith.addf %129, %130 : vector<8x128xf32>
    %132 = math.tanh %131 : vector<8x128xf32>
    %133 = arith.mulf %128, %132 : vector<8x128xf32>
    %c4_i32 = arith.constant 4 : i32
    %134 = arith.index_cast %c4_i32 : i32 to index
    %c0_40 = arith.constant 0 : index
    %c0_41 = arith.constant 0 : index
    %135 = vector.load %arg8[%134, %c0_40, %c0_41] : memref<8x8x512xf32, #tpu.memory_space<vmem>>, vector<1x8x512xf32>
    %136 = vector.shape_cast %135 : vector<1x8x512xf32> to vector<8x512xf32>
    %cst_42 = arith.constant dense<0.000000e+00> : vector<8x512xf32>
    %137 = tpu.matmul %133, %11, %cst_42 {dimension_numbers = #tpu.dot_dimension_numbers<[1], [0], [0], [1], [0, 0, 1, 1], [], []>} : vector<8x128xf32>, vector<128x512xf32>, vector<8x512xf32> -> vector<8x512xf32>
    %138 = arith.addf %136, %137 : vector<8x512xf32>
    %139 = vector.extract_strided_slice %138 {offsets = [0, 0], sizes = [8, 128], strides = [1, 1]} : vector<8x512xf32> to vector<8x128xf32>
    %140 = arith.negf %139 : vector<8x128xf32>
    %141 = math.exp %140 : vector<8x128xf32>
    %cst_43 = arith.constant 1.000000e+00 : f32
    %142 = vector.broadcast %cst_43 : f32 to vector<8x128xf32>
    %143 = arith.addf %142, %141 : vector<8x128xf32>
    %144 = arith.divf %142, %143 : vector<8x128xf32>
    %145 = vector.extract_strided_slice %138 {offsets = [0, 128], sizes = [8, 128], strides = [1, 1]} : vector<8x512xf32> to vector<8x128xf32>
    %146 = arith.negf %145 : vector<8x128xf32>
    %147 = math.exp %146 : vector<8x128xf32>
    %cst_44 = arith.constant 1.000000e+00 : f32
    %148 = vector.broadcast %cst_44 : f32 to vector<8x128xf32>
    %149 = arith.addf %148, %147 : vector<8x128xf32>
    %150 = arith.divf %148, %149 : vector<8x128xf32>
    %151 = vector.extract_strided_slice %138 {offsets = [0, 256], sizes = [8, 128], strides = [1, 1]} : vector<8x512xf32> to vector<8x128xf32>
    %152 = math.tanh %151 : vector<8x128xf32>
    %153 = vector.extract_strided_slice %138 {offsets = [0, 384], sizes = [8, 128], strides = [1, 1]} : vector<8x512xf32> to vector<8x128xf32>
    %154 = arith.negf %153 : vector<8x128xf32>
    %155 = math.exp %154 : vector<8x128xf32>
    %cst_45 = arith.constant 1.000000e+00 : f32
    %156 = vector.broadcast %cst_45 : f32 to vector<8x128xf32>
    %157 = arith.addf %156, %155 : vector<8x128xf32>
    %158 = arith.divf %156, %157 : vector<8x128xf32>
    %159 = arith.mulf %150, %131 : vector<8x128xf32>
    %160 = arith.mulf %144, %152 : vector<8x128xf32>
    %161 = arith.addf %159, %160 : vector<8x128xf32>
    %162 = math.tanh %161 : vector<8x128xf32>
    %163 = arith.mulf %158, %162 : vector<8x128xf32>
    %c5_i32 = arith.constant 5 : i32
    %164 = arith.index_cast %c5_i32 : i32 to index
    %c0_46 = arith.constant 0 : index
    %c0_47 = arith.constant 0 : index
    %165 = vector.load %arg8[%164, %c0_46, %c0_47] : memref<8x8x512xf32, #tpu.memory_space<vmem>>, vector<1x8x512xf32>
    %166 = vector.shape_cast %165 : vector<1x8x512xf32> to vector<8x512xf32>
    %cst_48 = arith.constant dense<0.000000e+00> : vector<8x512xf32>
    %167 = tpu.matmul %163, %11, %cst_48 {dimension_numbers = #tpu.dot_dimension_numbers<[1], [0], [0], [1], [0, 0, 1, 1], [], []>} : vector<8x128xf32>, vector<128x512xf32>, vector<8x512xf32> -> vector<8x512xf32>
    %168 = arith.addf %166, %167 : vector<8x512xf32>
    %169 = vector.extract_strided_slice %168 {offsets = [0, 0], sizes = [8, 128], strides = [1, 1]} : vector<8x512xf32> to vector<8x128xf32>
    %170 = arith.negf %169 : vector<8x128xf32>
    %171 = math.exp %170 : vector<8x128xf32>
    %cst_49 = arith.constant 1.000000e+00 : f32
    %172 = vector.broadcast %cst_49 : f32 to vector<8x128xf32>
    %173 = arith.addf %172, %171 : vector<8x128xf32>
    %174 = arith.divf %172, %173 : vector<8x128xf32>
    %175 = vector.extract_strided_slice %168 {offsets = [0, 128], sizes = [8, 128], strides = [1, 1]} : vector<8x512xf32> to vector<8x128xf32>
    %176 = arith.negf %175 : vector<8x128xf32>
    %177 = math.exp %176 : vector<8x128xf32>
    %cst_50 = arith.constant 1.000000e+00 : f32
    %178 = vector.broadcast %cst_50 : f32 to vector<8x128xf32>
    %179 = arith.addf %178, %177 : vector<8x128xf32>
    %180 = arith.divf %178, %179 : vector<8x128xf32>
    %181 = vector.extract_strided_slice %168 {offsets = [0, 256], sizes = [8, 128], strides = [1, 1]} : vector<8x512xf32> to vector<8x128xf32>
    %182 = math.tanh %181 : vector<8x128xf32>
    %183 = vector.extract_strided_slice %168 {offsets = [0, 384], sizes = [8, 128], strides = [1, 1]} : vector<8x512xf32> to vector<8x128xf32>
    %184 = arith.negf %183 : vector<8x128xf32>
    %185 = math.exp %184 : vector<8x128xf32>
    %cst_51 = arith.constant 1.000000e+00 : f32
    %186 = vector.broadcast %cst_51 : f32 to vector<8x128xf32>
    %187 = arith.addf %186, %185 : vector<8x128xf32>
    %188 = arith.divf %186, %187 : vector<8x128xf32>
    %189 = arith.mulf %180, %161 : vector<8x128xf32>
    %190 = arith.mulf %174, %182 : vector<8x128xf32>
    %191 = arith.addf %189, %190 : vector<8x128xf32>
    %192 = math.tanh %191 : vector<8x128xf32>
    %193 = arith.mulf %188, %192 : vector<8x128xf32>
    %c6_i32 = arith.constant 6 : i32
    %194 = arith.index_cast %c6_i32 : i32 to index
    %c0_52 = arith.constant 0 : index
    %c0_53 = arith.constant 0 : index
    %195 = vector.load %arg8[%194, %c0_52, %c0_53] : memref<8x8x512xf32, #tpu.memory_space<vmem>>, vector<1x8x512xf32>
    %196 = vector.shape_cast %195 : vector<1x8x512xf32> to vector<8x512xf32>
    %cst_54 = arith.constant dense<0.000000e+00> : vector<8x512xf32>
    %197 = tpu.matmul %193, %11, %cst_54 {dimension_numbers = #tpu.dot_dimension_numbers<[1], [0], [0], [1], [0, 0, 1, 1], [], []>} : vector<8x128xf32>, vector<128x512xf32>, vector<8x512xf32> -> vector<8x512xf32>
    %198 = arith.addf %196, %197 : vector<8x512xf32>
    %199 = vector.extract_strided_slice %198 {offsets = [0, 0], sizes = [8, 128], strides = [1, 1]} : vector<8x512xf32> to vector<8x128xf32>
    %200 = arith.negf %199 : vector<8x128xf32>
    %201 = math.exp %200 : vector<8x128xf32>
    %cst_55 = arith.constant 1.000000e+00 : f32
    %202 = vector.broadcast %cst_55 : f32 to vector<8x128xf32>
    %203 = arith.addf %202, %201 : vector<8x128xf32>
    %204 = arith.divf %202, %203 : vector<8x128xf32>
    %205 = vector.extract_strided_slice %198 {offsets = [0, 128], sizes = [8, 128], strides = [1, 1]} : vector<8x512xf32> to vector<8x128xf32>
    %206 = arith.negf %205 : vector<8x128xf32>
    %207 = math.exp %206 : vector<8x128xf32>
    %cst_56 = arith.constant 1.000000e+00 : f32
    %208 = vector.broadcast %cst_56 : f32 to vector<8x128xf32>
    %209 = arith.addf %208, %207 : vector<8x128xf32>
    %210 = arith.divf %208, %209 : vector<8x128xf32>
    %211 = vector.extract_strided_slice %198 {offsets = [0, 256], sizes = [8, 128], strides = [1, 1]} : vector<8x512xf32> to vector<8x128xf32>
    %212 = math.tanh %211 : vector<8x128xf32>
    %213 = vector.extract_strided_slice %198 {offsets = [0, 384], sizes = [8, 128], strides = [1, 1]} : vector<8x512xf32> to vector<8x128xf32>
    %214 = arith.negf %213 : vector<8x128xf32>
    %215 = math.exp %214 : vector<8x128xf32>
    %cst_57 = arith.constant 1.000000e+00 : f32
    %216 = vector.broadcast %cst_57 : f32 to vector<8x128xf32>
    %217 = arith.addf %216, %215 : vector<8x128xf32>
    %218 = arith.divf %216, %217 : vector<8x128xf32>
    %219 = arith.mulf %210, %191 : vector<8x128xf32>
    %220 = arith.mulf %204, %212 : vector<8x128xf32>
    %221 = arith.addf %219, %220 : vector<8x128xf32>
    %222 = math.tanh %221 : vector<8x128xf32>
    %223 = arith.mulf %218, %222 : vector<8x128xf32>
    %c7_i32 = arith.constant 7 : i32
    %224 = arith.index_cast %c7_i32 : i32 to index
    %c0_58 = arith.constant 0 : index
    %c0_59 = arith.constant 0 : index
    %225 = vector.load %arg8[%224, %c0_58, %c0_59] : memref<8x8x512xf32, #tpu.memory_space<vmem>>, vector<1x8x512xf32>
    %226 = vector.shape_cast %225 : vector<1x8x512xf32> to vector<8x512xf32>
    %cst_60 = arith.constant dense<0.000000e+00> : vector<8x512xf32>
    %227 = tpu.matmul %223, %11, %cst_60 {dimension_numbers = #tpu.dot_dimension_numbers<[1], [0], [0], [1], [0, 0, 1, 1], [], []>} : vector<8x128xf32>, vector<128x512xf32>, vector<8x512xf32> -> vector<8x512xf32>
    %228 = arith.addf %226, %227 : vector<8x512xf32>
    %229 = vector.extract_strided_slice %228 {offsets = [0, 0], sizes = [8, 128], strides = [1, 1]} : vector<8x512xf32> to vector<8x128xf32>
    %230 = arith.negf %229 : vector<8x128xf32>
    %231 = math.exp %230 : vector<8x128xf32>
    %cst_61 = arith.constant 1.000000e+00 : f32
    %232 = vector.broadcast %cst_61 : f32 to vector<8x128xf32>
    %233 = arith.addf %232, %231 : vector<8x128xf32>
    %234 = arith.divf %232, %233 : vector<8x128xf32>
    %235 = vector.extract_strided_slice %228 {offsets = [0, 128], sizes = [8, 128], strides = [1, 1]} : vector<8x512xf32> to vector<8x128xf32>
    %236 = arith.negf %235 : vector<8x128xf32>
    %237 = math.exp %236 : vector<8x128xf32>
    %cst_62 = arith.constant 1.000000e+00 : f32
    %238 = vector.broadcast %cst_62 : f32 to vector<8x128xf32>
    %239 = arith.addf %238, %237 : vector<8x128xf32>
    %240 = arith.divf %238, %239 : vector<8x128xf32>
    %241 = vector.extract_strided_slice %228 {offsets = [0, 256], sizes = [8, 128], strides = [1, 1]} : vector<8x512xf32> to vector<8x128xf32>
    %242 = math.tanh %241 : vector<8x128xf32>
    %243 = vector.extract_strided_slice %228 {offsets = [0, 384], sizes = [8, 128], strides = [1, 1]} : vector<8x512xf32> to vector<8x128xf32>
    %244 = arith.negf %243 : vector<8x128xf32>
    %245 = math.exp %244 : vector<8x128xf32>
    %cst_63 = arith.constant 1.000000e+00 : f32
    %246 = vector.broadcast %cst_63 : f32 to vector<8x128xf32>
    %247 = arith.addf %246, %245 : vector<8x128xf32>
    %248 = arith.divf %246, %247 : vector<8x128xf32>
    %249 = arith.mulf %240, %221 : vector<8x128xf32>
    %250 = arith.mulf %234, %242 : vector<8x128xf32>
    %251 = arith.addf %249, %250 : vector<8x128xf32>
    %252 = math.tanh %251 : vector<8x128xf32>
    %253 = arith.mulf %248, %252 : vector<8x128xf32>
    %c8_i32 = arith.constant 8 : i32
    %c0_64 = arith.constant 0 : index
    %c0_65 = arith.constant 0 : index
    %254 = vector.load %arg9[%c0_64, %c0_65] : memref<8x128xf32, #tpu.memory_space<vmem>>, vector<8x128xf32>
    tpu.vector_store %arg9[%c0_64, %c0_65], %253 {strides = array<i32>} : memref<8x128xf32, #tpu.memory_space<vmem>>, vector<8x128xf32>,
    %c0_66 = arith.constant 0 : index
    %c0_67 = arith.constant 0 : index
    %255 = vector.load %arg10[%c0_66, %c0_67] : memref<8x128xf32, #tpu.memory_space<vmem>>, vector<8x128xf32>
    tpu.vector_store %arg10[%c0_66, %c0_67], %251 {strides = array<i32>} : memref<8x128xf32, #tpu.memory_space<vmem>>, vector<8x128xf32>,
    %c0_i32_68 = arith.constant 0 : i32
    %256 = arith.cmpi eq, %arg0, %c0_i32_68 : i32
    %257 = arith.extui %256 : i1 to i32
    %c0_i32_69 = arith.constant 0 : i32
    %258 = arith.cmpi ne, %257, %c0_i32_69 : i32
    scf.if %258 {
      %c0_70 = arith.constant 0 : index
      %c0_71 = arith.constant 0 : index
      %259 = vector.load %arg5[%c0_70, %c0_71] : memref<128x16xf32, #tpu.memory_space<vmem>>, vector<128x16xf32>
      %cst_72 = arith.constant dense<0.000000e+00> : vector<8x16xf32>
      %260 = tpu.matmul %253, %259, %cst_72 {dimension_numbers = #tpu.dot_dimension_numbers<[1], [0], [0], [1], [0, 0, 1, 1], [], []>} : vector<8x128xf32>, vector<128x16xf32>, vector<8x16xf32> -> vector<8x16xf32>
      %c0_73 = arith.constant 0 : index
      %c0_74 = arith.constant 0 : index
      %261 = vector.load %arg6[%c0_73, %c0_74] : memref<1x16xf32, #tpu.memory_space<vmem>>, vector<1x16xf32>
      %262 = vector.broadcast %261 : vector<1x16xf32> to vector<8x16xf32>
      %263 = arith.addf %260, %262 : vector<8x16xf32>
      %cst_75 = arith.constant dense<0xFF800000> : vector<8xf32>
      %264 = vector.multi_reduction <maximumf>, %263, %cst_75 [1] : vector<8x16xf32> to vector<8xf32>
      %265 = vector.shape_cast %264 : vector<8xf32> to vector<8x1xf32>
      %266 = vector.broadcast %265 : vector<8x1xf32> to vector<8x16xf32>
      %267 = arith.subf %263, %266 : vector<8x16xf32>
      %268 = math.exp %267 : vector<8x16xf32>
      %cst_76 = arith.constant dense<0.000000e+00> : vector<8xf32>
      %269 = vector.multi_reduction <add>, %268, %cst_76 [1] : vector<8x16xf32> to vector<8xf32>
      %270 = vector.shape_cast %269 : vector<8xf32> to vector<8x1xf32>
      %271 = math.log %270 : vector<8x1xf32>
      %272 = vector.broadcast %271 : vector<8x1xf32> to vector<8x16xf32>
      %273 = arith.subf %267, %272 : vector<8x16xf32>
      %c0_77 = arith.constant 0 : index
      %c0_78 = arith.constant 0 : index
      %274 = vector.load %arg7[%c0_77, %c0_78] : memref<8x16xf32, #tpu.memory_space<vmem>>, vector<8x16xf32>
      tpu.vector_store %arg7[%c0_77, %c0_78], %273 {strides = array<i32>} : memref<8x16xf32, #tpu.memory_space<vmem>>, vector<8x16xf32>,
    } else {
    }
    return
  }
  func.func @transform_0(%arg0: i32) -> (i32, i32) {
    %c0_i32 = arith.constant 0 : i32
    %c0_i32_0 = arith.constant 0 : i32
    return %arg0, %c0_i32 : i32, i32
  }
  func.func @transform_1(%arg0: i32) -> (i32, i32) {
    %c0_i32 = arith.constant 0 : i32
    %c0_i32_0 = arith.constant 0 : i32
    %c0_i32_1 = arith.constant 0 : i32
    return %c0_i32, %c0_i32_0 : i32, i32
  }
  func.func @transform_2(%arg0: i32) -> (i32, i32) {
    %c0_i32 = arith.constant 0 : i32
    %c0_i32_0 = arith.constant 0 : i32
    %c0_i32_1 = arith.constant 0 : i32
    return %c0_i32, %c0_i32_0 : i32, i32
  }
  func.func @transform_3(%arg0: i32) -> (i32, i32) {
    %c0_i32 = arith.constant 0 : i32
    %c0_i32_0 = arith.constant 0 : i32
    %c0_i32_1 = arith.constant 0 : i32
    return %c0_i32, %c0_i32_0 : i32, i32
  }
  func.func @transform_4(%arg0: i32) -> (i32, i32) {
    %c0_i32 = arith.constant 0 : i32
    %c0_i32_0 = arith.constant 0 : i32
    %c0_i32_1 = arith.constant 0 : i32
    return %c0_i32, %c0_i32_0 : i32, i32
  }
  func.func @transform_5(%arg0: i32) -> (i32, i32) {
    %c0_i32 = arith.constant 0 : i32
    %c0_i32_0 = arith.constant 0 : i32
    %c0_i32_1 = arith.constant 0 : i32
    return %c0_i32, %c0_i32_0 : i32, i32
  }
  func.func @transform_6(%arg0: i32) -> (i32, i32) {
    %c0_i32 = arith.constant 0 : i32
    %c0_i32_0 = arith.constant 0 : i32
    %c0_i32_1 = arith.constant 0 : i32
    return %c0_i32, %c0_i32_0 : i32, i32
  }
}

</mosaic_0001>

<bundles_post_ra>
// kernel: lstm_forward.1
= control target key start
LH: loop header
LB: loop body
LE: loop exit
PB: predicated region body
PF: predicated region fallthrough
CT: control target
= control target key end

     0   :  { %11 = vsyncpa [#allocation6], 0  ;;  %s2797_s21 = smov [#allocation5]   ;;  %s3385_s0 = inlined_call_operand.vmem [shape: f32[64,8], index: 0, kind: input, shape index: {}]   ;;  %s3386_s1 = inlined_call_operand.vmem [shape: f32[8,512], index: 1, kind: input, shape index: {}]   ;;  %s3387_s2 = inlined_call_operand.hbm [shape: f32[128,512], index: 2, kind: input, shape index: {}]   ;;  %s3388_s3 = inlined_call_operand.vmem [shape: f32[1,512], index: 3, kind: input, shape index: {}]   ;;  %s3389_s4 = inlined_call_operand.vmem [shape: f32[128,16], index: 4, kind: input, shape index: {}]   ;;  %s3390_s5 = inlined_call_operand.vmem [shape: f32[1,16], index: 5, kind: input, shape index: {}]   ;;  %s3391_s6 = inlined_call_operand.vmem [shape: f32[8,16], index: 6, kind: output, shape index: {}]  }
   0x1   :  { %s21_s22 = sshll.u32 %s2797_s21, 4  ;;  %s2773_s25 = scalar_lea.hbm %s3387_s2, 8192  ;;  %s22_s22 = int_to_ptr.vmem [resolvable:$true] %s21_s22 }
   0x2   :  { %p2774_p0 = scmp.ne.s32.totalorder %s3387_s2, %s2773_s25  ;;  %p2777_p1 = scmp.lt.u32.totalorder %s2773_s25, %s3387_s2 }
   0x4   :  { %p2779_p2 = pnand %p2777_p1, %p2774_p0 }
   0x6   :  { %2782 = shalt.err (!%p2779_p2)
}
   0x7   :  { %s2783_s30 = scalar_lea.vmem %s22_s22, 8192  ;;  %p2788_p4 = scmp.lt.s32.totalorder %s22_s22, %s22_s22 }
   0x8   :  { %p2784_p3 = scmp.ne.s32.totalorder %s22_s22, %s2783_s30  ;;  %p2789_p5 = scmp.lt.s32.totalorder %s2783_s30, %s2783_s30 }
   0xa   :  { %p2790_p6 = por %p2789_p5, %p2788_p4 }
   0xc   :  { %p2791_p7 = pnand %p2790_p6, %p2784_p3 }
   0xe   :  { %2794 = shalt.err (!%p2791_p7)
}
   0xf   :  { %s2798_s7 = smov 512   ;;  %s2799_s8 = smov 32  }
  0x10   :  { %27 = dma.hbm_to_vmem [thread:$0]  %s3387_s2, 8192, %s22_s22, [#allocation6], %s2798_s7, %s2798_s7, %s2799_s8  }
  0x11   :  { %2795 = dma.done.wait [#allocation6], 8192  }
  0x12   :  { %2796 = vsyncadd [#allocation6], 4294959104  ;;  %v2800_v0 = vmov 0.0   ;;  %v52_v1 = vld [vmem:[%s3386_s1 + $0x8] sm:$0xff]  ;;  %v54_v2 = vld [vmem:[%s3386_s1 + $0x18] sm:$0xff]  ;;  %vm77_vm0 = vcmask 64512  }
  0x13   :  { %166 = vmatprep.mubr.f32.mxu0 %v2800_v0  ;;  %279 = vmatprep.mubr.f32.mxu1 %v2800_v0  ;;  %v51_v3 = vld [vmem:[%s3386_s1] sm:$0xff]  ;;  %v53_v4 = vld [vmem:[%s3386_s1 + $0x10] sm:$0xff]  ;;  %v361_v6 = vld [vmem:[#allocation5 + $0x8] sm:$0xff]  ;;  %vm2802_vm1 = vmmov 0   ;;  %vm1923_vm2 = vcmask 130048  }
  0x14   :  { %102 = vmatprep.subr.mxu0 %v52_v1  ;;  %215 = vmatprep.subr.mxu1 %v54_v2  ;;  %v43_v5 = vld [vmem:[%s3385_s0] sm:$0xff]  ;;  %v365_v7 = vld [vmem:[#allocation5 + $0x28] sm:$0xff]  ;;  %v363_v8 = vld [vmem:[#allocation5 + $0x18] sm:$0xff] }
  0x15   :  { %103 = vmatpush1.msra.mxu0 %v51_v3  ;;  %216 = vmatpush1.msra.mxu1 %v53_v4  ;;  %v367_v9 = vld [vmem:[#allocation5 + $0x38] sm:$0xff]  ;;  %v2869_v10 = vpack.c.bf16 %v365_v7, %v361_v6  ;;  %v360_v12 = vld [vmem:[#allocation5] sm:$0xff]  ;;  %v362_v14 = vld [vmem:[#allocation5 + $0x10] sm:$0xff] }
  0x16   :  { %1942 = vmatmul.mubr.msk.f32.vlgmr.msra.gmra.mrb[0].mxu0 %vm77_vm0, %v43_v5  ;;  %1950 = vmatmul.mubr.msk.f32.vlgmr.msra.gmra.mrb[0].mxu1 %vm77_vm0, %v43_v5  ;;  %v2871_v11 = vpack.c.bf16 %v367_v9, %v363_v8  ;;  %v364_v13 = vld [vmem:[#allocation5 + $0x20] sm:$0xff]  ;;  %v366_v16 = vld [vmem:[#allocation5 + $0x30] sm:$0xff]  ;;  %v44_v17 = vld [vmem:[%s3385_s0 + $0x8] sm:$0xff] }
  0x17   :  { %v2873_v15 = vpack.c.bf16 %v364_v13, %v360_v12  ;;  %172 = vmatprep.mubr.f32.mxu0 %v2800_v0  ;;  %285 = vmatprep.mubr.f32.mxu1 %v2800_v0  ;;  %v369_v18 = vld [vmem:[#allocation5 + $0x48] sm:$0xff]  ;;  %v2882_v19 = vpack.c.bf16 %v366_v16, %v362_v14  ;;  %v371_v21 = vld [vmem:[#allocation5 + $0x58] sm:$0xff]  ;;  %v368_v25 = vld [vmem:[#allocation5 + $0x40] sm:$0xff] }
  0x18   :  { %2036 = vmatprep.subr.bf16.mxu0 %v2869_v10  ;;  %2068 = vmatprep.subr.bf16.mxu1 %v2871_v11  ;;  %v373_v20 = vld [vmem:[#allocation5 + $0x68] sm:$0xff]  ;;  %v375_v22 = vld [vmem:[#allocation5 + $0x78] sm:$0xff]  ;;  %v372_v26 = vld [vmem:[#allocation5 + $0x60] sm:$0xff] }
  0x19   :  { %2038 = vmatpush1.bf16.msra.mxu0 %v2873_v15  ;;  %v2885_v23 = vpack.c.bf16 %v373_v20, %v369_v18  ;;  %v2887_v24 = vpack.c.bf16 %v375_v22, %v371_v21  ;;  %v370_v27 = vld [vmem:[#allocation5 + $0x50] sm:$0xff]  ;;  %2070 = vmatpush1.bf16.msra.mxu1 %v2882_v19  ;;  %v2891_v28 = vpack.c.bf16 %v372_v26, %v368_v25  ;;  %v377_v31 = vld [vmem:[#allocation5 + $0x88] sm:$0xff]  ;;  %v379_v34 = vld [vmem:[#allocation5 + $0x98] sm:$0xff] }
  0x1a   :  { %1943 = vmatmul.mubr.msk.f32.gmra.mrb[2].mxu0 %vm77_vm0, %v44_v17  ;;  %v374_v29 = vld [vmem:[#allocation5 + $0x70] sm:$0xff]  ;;  %1951 = vmatmul.mubr.msk.f32.gmra.mrb[2].mxu1 %vm77_vm0, %v44_v17  ;;  %v381_v33 = vld [vmem:[#allocation5 + $0xa8] sm:$0xff]  ;;  %v383_v35 = vld [vmem:[#allocation5 + $0xb8] sm:$0xff] }
  0x1b   :  { %v45_v30 = vld [vmem:[%s3385_s0 + $0x10] sm:$0xff]  ;;  %2040 = vmatprep.subr.bf16.mxu0 %v2885_v23  ;;  %v2898_v32 = vpack.c.bf16 %v374_v29, %v370_v27  ;;  %2072 = vmatprep.subr.bf16.mxu1 %v2887_v24  ;;  %v2902_v36 = vpack.c.bf16 %v381_v33, %v377_v31  ;;  %v2904_v37 = vpack.c.bf16 %v383_v35, %v379_v34  ;;  %v376_v38 = vld [vmem:[#allocation5 + $0x80] sm:$0xff]  ;;  %v46_v43 = vld [vmem:[%s3385_s0 + $0x18] sm:$0xff] }
  0x1c   :  { %178 = vmatprep.mubr.f32.mxu0 %v2800_v0  ;;  %v380_v39 = vld [vmem:[#allocation5 + $0xa0] sm:$0xff]  ;;  %v378_v40 = vld [vmem:[#allocation5 + $0x90] sm:$0xff]  ;;  %291 = vmatprep.mubr.f32.mxu1 %v2800_v0  ;;  %v385_v44 = vld [vmem:[#allocation5 + $0xc8] sm:$0xff] }
  0x1d   :  { %2042 = vmatpush1.bf16.msra.mxu0 %v2891_v28  ;;  %v2908_v41 = vpack.c.bf16 %v380_v39, %v376_v38  ;;  %v382_v42 = vld [vmem:[#allocation5 + $0xb0] sm:$0xff]  ;;  %2074 = vmatpush1.bf16.msra.mxu1 %v2898_v32  ;;  %v389_v46 = vld [vmem:[#allocation5 + $0xe8] sm:$0xff]  ;;  %v387_v47 = vld [vmem:[#allocation5 + $0xd8] sm:$0xff] }
  0x1e   :  { %1944 = vmatmul.mubr.msk.f32.gmra.mrb[4].mxu0 %vm77_vm0, %v45_v30  ;;  %v2915_v45 = vpack.c.bf16 %v382_v42, %v378_v40  ;;  %v391_v48 = vld [vmem:[#allocation5 + $0xf8] sm:$0xff]  ;;  %1952 = vmatmul.mubr.msk.f32.gmra.mrb[4].mxu1 %vm77_vm0, %v45_v30  ;;  %v2919_v49 = vpack.c.bf16 %v389_v46, %v385_v44  ;;  %v384_v50 = vld [vmem:[#allocation5 + $0xc0] sm:$0xff]  ;;  %v386_v52 = vld [vmem:[#allocation5 + $0xd0] sm:$0xff] }
  0x1f   :  { %2044 = vmatprep.subr.bf16.mxu0 %v2902_v36  ;;  %v388_v51 = vld [vmem:[#allocation5 + $0xe0] sm:$0xff]  ;;  %2076 = vmatprep.subr.bf16.mxu1 %v2904_v37  ;;  %v2923_v53 = vpack.c.bf16 %v391_v48, %v387_v47  ;;  %v390_v54 = vld [vmem:[#allocation5 + $0xf0] sm:$0xff]  ;;  %v393_v55 = vld [vmem:[#allocation5 + $0x108] sm:$0xff] }
  0x20   :  { %184 = vmatprep.mubr.f32.mxu0 %v2800_v0  ;;  %297 = vmatprep.mubr.f32.mxu1 %v2800_v0  ;;  %v2927_v56 = vpack.c.bf16 %v388_v51, %v384_v50  ;;  %v397_v57 = vld [vmem:[#allocation5 + $0x128] sm:$0xff]  ;;  %v395_v58 = vld [vmem:[#allocation5 + $0x118] sm:$0xff]  ;;  %v2931_v60 = vpack.c.bf16 %v390_v54, %v386_v52  ;;  %v392_v61 = vld [vmem:[#allocation5 + $0x100] sm:$0xff] }
  0x21   :  { %2046 = vmatpush1.bf16.msra.mxu0 %v2908_v41  ;;  %v399_v59 = vld [vmem:[#allocation5 + $0x138] sm:$0xff]  ;;  %2078 = vmatpush1.bf16.msra.mxu1 %v2915_v45  ;;  %v396_v62 = vld [vmem:[#allocation5 + $0x120] sm:$0xff]  ;;  %v2938_v1 = vpack.c.bf16 %v397_v57, %v393_v55  ;;  %v394_v2 = vld [vmem:[#allocation5 + $0x110] sm:$0xff] }
  0x22   :  { %1945 = vmatmul.mubr.msk.f32.gmra.mrb[6].mxu0 %vm77_vm0, %v46_v43  ;;  %1953 = vmatmul.mubr.msk.f32.gmra.mrb[6].mxu1 %vm77_vm0, %v46_v43  ;;  %v47_v63 = vld [vmem:[%s3385_s0 + $0x20] sm:$0xff]  ;;  %v398_v3 = vld [vmem:[#allocation5 + $0x130] sm:$0xff]  ;;  %v2942_v4 = vpack.c.bf16 %v399_v59, %v395_v58  ;;  %v401_v5 = vld [vmem:[#allocation5 + $0x148] sm:$0xff]  ;;  %v2946_v7 = vpack.c.bf16 %v396_v62, %v392_v61  ;;  %v57_v62 = vlaneseq }
  0x23   :  { %2048 = vmatprep.subr.bf16.mxu0 %v2919_v49  ;;  %2080 = vmatprep.subr.bf16.mxu1 %v2923_v53  ;;  %v405_v6 = vld [vmem:[#allocation5 + $0x168] sm:$0xff]  ;;  %v403_v8 = vld [vmem:[#allocation5 + $0x158] sm:$0xff]  ;;  %v2950_v12 = vpack.c.bf16 %v398_v3, %v394_v2  ;;  %v400_v13 = vld [vmem:[#allocation5 + $0x140] sm:$0xff] }
  0x24   :  { %190 = vmatprep.mubr.f32.mxu0 %v2800_v0  ;;  %303 = vmatprep.mubr.f32.mxu1 %v2800_v0  ;;  %v407_v9 = vld [vmem:[#allocation5 + $0x178] sm:$0xff]  ;;  %v404_v14 = vld [vmem:[#allocation5 + $0x160] sm:$0xff]  ;;  %v48_v16 = vld [vmem:[%s3385_s0 + $0x28] sm:$0xff]  ;;  %v2957_v17 = vpack.c.bf16 %v405_v6, %v401_v5 }
  0x25   :  { %2050 = vmatpush1.bf16.msra.mxu0 %v2927_v56  ;;  %2082 = vmatpush1.bf16.msra.mxu1 %v2931_v60  ;;  %v402_v18 = vld [vmem:[#allocation5 + $0x150] sm:$0xff]  ;;  %v2961_v21 = vpack.c.bf16 %v407_v9, %v403_v8  ;;  %v409_v22 = vld [vmem:[#allocation5 + $0x188] sm:$0xff]  ;;  %v2965_v26 = vpack.c.bf16 %v404_v14, %v400_v13  ;;  %v411_v27 = vld [vmem:[#allocation5 + $0x198] sm:$0xff] }
  0x26   :  { %1946 = vmatmul.mubr.msk.f32.gmra.mrb[8].mxu0 %vm77_vm0, %v47_v63  ;;  %1954 = vmatmul.mubr.msk.f32.gmra.mrb[8].mxu1 %vm77_vm0, %v47_v63  ;;  %v406_v20 = vld [vmem:[#allocation5 + $0x170] sm:$0xff]  ;;  %v413_v25 = vld [vmem:[#allocation5 + $0x1a8] sm:$0xff]  ;;  %v415_v29 = vld [vmem:[#allocation5 + $0x1b8] sm:$0xff]  ;;  %v58_v63 = vshrl.u32 %v57_v62, 7 }
  0x27   :  { %2052 = vmatprep.subr.bf16.mxu0 %v2938_v1  ;;  %2084 = vmatprep.subr.bf16.mxu1 %v2942_v4  ;;  %v2969_v30 = vpack.c.bf16 %v406_v20, %v402_v18  ;;  %v408_v31 = vld [vmem:[#allocation5 + $0x180] sm:$0xff]  ;;  %v49_v34 = vld [vmem:[%s3385_s0 + $0x30] sm:$0xff]  ;;  %v2976_v35 = vpack.c.bf16 %v413_v25, %v409_v22  ;;  %v2980_v40 = vpack.c.bf16 %v415_v29, %v411_v27  ;;  %v417_v42 = vld [vmem:[#allocation5 + $0x1c8] sm:$0xff] }
  0x28   :  { %196 = vmatprep.mubr.f32.mxu0 %v2800_v0  ;;  %309 = vmatprep.mubr.f32.mxu1 %v2800_v0  ;;  %v412_v33 = vld [vmem:[#allocation5 + $0x1a0] sm:$0xff]  ;;  %v410_v38 = vld [vmem:[#allocation5 + $0x190] sm:$0xff]  ;;  %v421_v43 = vld [vmem:[#allocation5 + $0x1e8] sm:$0xff]  ;;  %v59_v2 = vsub.s32 0, %v58_v63  ;;  %v63_v5 = vsub.s32 1, %v58_v63  ;;  %v71_v13 = vsub.s32 3, %v58_v63 }
  0x29   :  { %2054 = vmatpush1.bf16.msra.mxu0 %v2946_v7  ;;  %2086 = vmatpush1.bf16.msra.mxu1 %v2950_v12  ;;  %v414_v39 = vld [vmem:[#allocation5 + $0x1b0] sm:$0xff]  ;;  %v2984_v44 = vpack.c.bf16 %v412_v33, %v408_v31  ;;  %v419_v46 = vld [vmem:[#allocation5 + $0x1d8] sm:$0xff]  ;;  %v416_v50 = vld [vmem:[#allocation5 + $0x1c0] sm:$0xff]  ;;  %v2995_v54 = vpack.c.bf16 %v421_v43, %v417_v42  ;;  %v67_v31 = vsub.s32 2, %v58_v63 }
  0x2a   :  { %1947 = vmatmul.mubr.msk.f32.gmra.mrb[10].mxu0 %vm77_vm0, %v48_v16  ;;  %1955 = vmatmul.mubr.msk.f32.gmra.mrb[10].mxu1 %vm77_vm0, %v48_v16  ;;  %v423_v47 = vld [vmem:[#allocation5 + $0x1f8] sm:$0xff]  ;;  %v2988_v48 = vpack.c.bf16 %v414_v39, %v410_v38  ;;  %v420_v51 = vld [vmem:[#allocation5 + $0x1e0] sm:$0xff]  ;;  %v418_v55 = vld [vmem:[#allocation5 + $0x1d0] sm:$0xff] }
  0x2b   :  { %2056 = vmatprep.subr.bf16.mxu0 %v2957_v17  ;;  %2088 = vmatprep.subr.bf16.mxu1 %v2961_v21  ;;  %v50_v52 = vld [vmem:[%s3385_s0 + $0x38] sm:$0xff]  ;;  %v422_v57 = vld [vmem:[#allocation5 + $0x1f0] sm:$0xff]  ;;  %v2999_v58 = vpack.c.bf16 %v423_v47, %v419_v46  ;;  %v3003_v59 = vpack.c.bf16 %v420_v51, %v416_v50  ;;  %v55_v3 = vld [vmem:[%s3388_s3] sm:$0xf] }
  0x2c   :  { %202 = vmatprep.mubr.f32.mxu0 %v2800_v0  ;;  %315 = vmatprep.mubr.f32.mxu1 %v2800_v0  ;;  %v3007_v61 = vpack.c.bf16 %v422_v57, %v418_v55  ;;  %v3057_v6 = vrot.slane %v55_v3, %v59_v2  ;;  %v3059_v8 = vrot.slane %v55_v3, %v63_v5 }
  0x2d   :  { %2058 = vmatpush1.bf16.msra.mxu0 %v2965_v26  ;;  %2090 = vmatpush1.bf16.msra.mxu1 %v2969_v30  ;;  %v3063_v29 = vrot.slane %v55_v3, %v71_v13 }
  0x2e   :  { %1948 = vmatmul.mubr.msk.f32.gmra.mrb[12].mxu0 %vm77_vm0, %v49_v34  ;;  %1956 = vmatmul.mubr.msk.f32.gmra.mrb[12].mxu1 %vm77_vm0, %v49_v34  ;;  %v3066_v34 = vrot.slane %v55_v3, %v67_v31 }
  0x2f   :  { %2060 = vmatprep.subr.bf16.mxu0 %v2976_v35  ;;  %2092 = vmatprep.subr.bf16.mxu1 %v2980_v40 }
  0x30   :  { %208 = vmatprep.mubr.f32.mxu0 %v2800_v0  ;;  %321 = vmatprep.mubr.f32.mxu1 %v2800_v0 }
  0x31   :  { %2062 = vmatpush1.bf16.msra.mxu0 %v2984_v44  ;;  %2094 = vmatpush1.bf16.msra.mxu1 %v2988_v48 }
  0x32   :  { %1949 = vmatmul.mubr.msk.f32.gmra.mrb[14].mxu0 %vm77_vm0, %v50_v52  ;;  %1957 = vmatmul.mubr.msk.f32.gmra.mrb[14].mxu1 %vm77_vm0, %v50_v52 }
  0x33   :  { %2064 = vmatprep.subr.bf16.mxu0 %v2995_v54  ;;  %2096 = vmatprep.subr.bf16.mxu1 %v2999_v58 }
  0x34   :  { %494 = vmatprep.mubr.f32.mxu0 %v2800_v0  ;;  %565 = vmatprep.mubr.f32.mxu1 %v2800_v0 }
  0x35   :  { %2066 = vmatpush1.bf16.msra.mxu0 %v3003_v59  ;;  %2098 = vmatpush1.bf16.msra.mxu1 %v3007_v61 }
  0x36   :  { %2100 = vmatprep.subr.bf16.mxu0 %v2869_v10  ;;  %2132 = vmatprep.subr.bf16.mxu1 %v2871_v11 }
  0x38   :  { %495 = vmatmul.mubr.f32.vlgmr.msra.gmra.mrb[0].mxu0 %v2800_v0  ;;  %566 = vmatmul.mubr.f32.vlgmr.msra.gmra.mrb[0].mxu1 %v2800_v0 }
  0x39   :  { %2102 = vmatpush1.bf16.msra.mxu0 %v2873_v15  ;;  %2134 = vmatpush1.bf16.msra.mxu1 %v2882_v19 }
  0x3a   :  { %2104 = vmatprep.subr.bf16.mxu0 %v2885_v23  ;;  %2136 = vmatprep.subr.bf16.mxu1 %v2887_v24 }
  0x3b   :  { %669 = vmatprep.mubr.f32.mxu0 %v2800_v0  ;;  %740 = vmatprep.mubr.f32.mxu1 %v2800_v0 }
  0x3d   :  { %2106 = vmatpush1.bf16.msra.mxu0 %v2891_v28  ;;  %2138 = vmatpush1.bf16.msra.mxu1 %v2898_v32 }
  0x3e   :  { %2108 = vmatprep.subr.bf16.mxu0 %v2902_v36  ;;  %2140 = vmatprep.subr.bf16.mxu1 %v2904_v37 }
  0x41   :  { %2110 = vmatpush1.bf16.msra.mxu0 %v2908_v41  ;;  %2142 = vmatpush1.bf16.msra.mxu1 %v2915_v45 }
  0x42   :  { %2112 = vmatprep.subr.bf16.mxu0 %v2919_v49  ;;  %2144 = vmatprep.subr.bf16.mxu1 %v2923_v53 }
  0x45   :  { %2114 = vmatpush1.bf16.msra.mxu0 %v2927_v56  ;;  %2146 = vmatpush1.bf16.msra.mxu1 %v2931_v60 }
  0x46   :  { %2116 = vmatprep.subr.bf16.mxu0 %v2938_v1  ;;  %2148 = vmatprep.subr.bf16.mxu1 %v2942_v4 }
  0x49   :  { %2118 = vmatpush1.bf16.msra.mxu0 %v2946_v7  ;;  %2150 = vmatpush1.bf16.msra.mxu1 %v2950_v12 }
  0x4a   :  { %2120 = vmatprep.subr.bf16.mxu0 %v2957_v17  ;;  %2152 = vmatprep.subr.bf16.mxu1 %v2961_v21 }
  0x4d   :  { %2122 = vmatpush1.bf16.msra.mxu0 %v2965_v26  ;;  %2154 = vmatpush1.bf16.msra.mxu1 %v2969_v30 }
  0x4e   :  { %2124 = vmatprep.subr.bf16.mxu0 %v2976_v35  ;;  %2156 = vmatprep.subr.bf16.mxu1 %v2980_v40 }
  0x51   :  { %2126 = vmatpush1.bf16.msra.mxu0 %v2984_v44  ;;  %2158 = vmatpush1.bf16.msra.mxu1 %v2988_v48 }
  0x52   :  { %2128 = vmatprep.subr.bf16.mxu0 %v2995_v54  ;;  %2160 = vmatprep.subr.bf16.mxu1 %v2999_v58 }
  0x55   :  { %2130 = vmatpush1.bf16.msra.mxu0 %v3003_v59  ;;  %2162 = vmatpush1.bf16.msra.mxu1 %v3007_v61 }
  0x56   :  { %2164 = vmatprep.subr.bf16.mxu0 %v2869_v10  ;;  %2196 = vmatprep.subr.bf16.mxu1 %v2871_v11 }
 0x10b   :  { %v496_v9 = vpop.f32.mrb[0].mxu0  ;;  %v567_v16 = vpop.f32.mrb[0].mxu1 }
 0x10c   :  { %v2571_v14 = vadd.f32 %v496_v9, %v3057_v6  ;;  %v498_v18 = vpop.f32.mrb[1].mxu0  ;;  %v569_v22 = vpop.f32.mrb[1].mxu1  ;;  %v2587_v39 = vadd.f32 %v567_v16, %v3066_v34 }
 0x10d   :  { %v2572_v20 = vadd.f32 %v498_v18, %v3059_v8  ;;  %v2588_v33 = vadd.f32 %v569_v22, %v3063_v29 }
 0x10e   :  { %v1958_v25 = vmul.f32 -1.442695, %v2571_v14 }
 0x10f   :  { %v1959_v27 = vmul.f32 -1.442695, %v2572_v20  ;;  %v1960_v38 = vmul.f32 -1.442695, %v2588_v33 }
 0x110   :  { %2641 = vpow2.f32 %v1958_v25 }
 0x111   :  { %2643 = vpow2.f32 %v1959_v27 }
 0x112   :  { %2645 = vpow2.f32 %v1960_v38 }
 0x113   :  { %2647 = vtanh.f32 %v2587_v39 }
 0x11a   :  { %v2642_v42 = vpop.eup %2641 }
 0x11b   :  { %v2644_v43 = vpop.eup %2643  ;;  %v579_v46 = vadd.f32 1.0, %v2642_v42 }
 0x11c   :  { %v585_v47 = vadd.f32 1.0, %v2644_v43  ;;  %v2646_v50 = vpop.eup %2645 }
 0x11d   :  { %2649 = vrcp.f32 %v579_v46  ;;  %v2648_v51 = vpop.eup %2647  ;;  %v592_v62 = vadd.f32 1.0, %v2646_v50 }
 0x11e   :  { %2651 = vrcp.f32 %v585_v47 }
 0x11f   :  { %2653 = vrcp.f32 %v592_v62 }
 0x127   :  { %v2650_v52 = vpop.eup %2649 }
 0x128   :  { %v2652_v55 = vpop.eup %2651  ;;  %v596_v57 = vmul.f32 %v2650_v52, %v2648_v51 }
 0x129   :  { %v595_v63 = vmul.f32 0.0, %v2652_v55  ;;  %v2654_v3 = vpop.eup %2653 }
 0x12b   :  { %v3069_v2 = vadd.f32 %v596_v57, %v595_v63 }
 0x12d   :  { %2655 = vtanh.f32 %v3069_v2 }
 0x137   :  { %v2656_v5 = vpop.eup %2655 }
 0x138   :  { %v599_v9 = vmul.f32 %v2656_v5, %v2654_v3 }
 0x13a   :  { %670 = vmatmul.mubr.f32.vlgmr.msra.gmra.mrb[2].mxu0 %v599_v9  ;;  %741 = vmatmul.mubr.f32.vlgmr.msra.gmra.mrb[2].mxu1 %v599_v9 }
 0x13b   :  { %2166 = vmatpush1.bf16.msra.mxu0 %v2873_v15  ;;  %2198 = vmatpush1.bf16.msra.mxu1 %v2882_v19 }
 0x13c   :  { %2168 = vmatprep.subr.bf16.mxu0 %v2885_v23  ;;  %2200 = vmatprep.subr.bf16.mxu1 %v2887_v24 }
 0x13d   :  { %844 = vmatprep.mubr.f32.mxu0 %v2800_v0  ;;  %915 = vmatprep.mubr.f32.mxu1 %v2800_v0 }
 0x13f   :  { %2170 = vmatpush1.bf16.msra.mxu0 %v2891_v28  ;;  %2202 = vmatpush1.bf16.msra.mxu1 %v2898_v32 }
 0x140   :  { %2172 = vmatprep.subr.bf16.mxu0 %v2902_v36  ;;  %2204 = vmatprep.subr.bf16.mxu1 %v2904_v37 }
 0x143   :  { %2174 = vmatpush1.bf16.msra.mxu0 %v2908_v41  ;;  %2206 = vmatpush1.bf16.msra.mxu1 %v2915_v45 }
 0x144   :  { %2176 = vmatprep.subr.bf16.mxu0 %v2919_v49  ;;  %2208 = vmatprep.subr.bf16.mxu1 %v2923_v53 }
 0x147   :  { %2178 = vmatpush1.bf16.msra.mxu0 %v2927_v56  ;;  %2210 = vmatpush1.bf16.msra.mxu1 %v2931_v60 }
 0x148   :  { %2180 = vmatprep.subr.bf16.mxu0 %v2938_v1  ;;  %2212 = vmatprep.subr.bf16.mxu1 %v2942_v4 }
 0x14b   :  { %2182 = vmatpush1.bf16.msra.mxu0 %v2946_v7  ;;  %2214 = vmatpush1.bf16.msra.mxu1 %v2950_v12 }
 0x14c   :  { %2184 = vmatprep.subr.bf16.mxu0 %v2957_v17  ;;  %2216 = vmatprep.subr.bf16.mxu1 %v2961_v21 }
 0x14f   :  { %2186 = vmatpush1.bf16.msra.mxu0 %v2965_v26  ;;  %2218 = vmatpush1.bf16.msra.mxu1 %v2969_v30 }
 0x150   :  { %2188 = vmatprep.subr.bf16.mxu0 %v2976_v35  ;;  %2220 = vmatprep.subr.bf16.mxu1 %v2980_v40 }
 0x153   :  { %2190 = vmatpush1.bf16.msra.mxu0 %v2984_v44  ;;  %2222 = vmatpush1.bf16.msra.mxu1 %v2988_v48 }
 0x154   :  { %2192 = vmatprep.subr.bf16.mxu0 %v2995_v54  ;;  %2224 = vmatprep.subr.bf16.mxu1 %v2999_v58 }
 0x157   :  { %2194 = vmatpush1.bf16.msra.mxu0 %v3003_v59  ;;  %2226 = vmatpush1.bf16.msra.mxu1 %v3007_v61 }
 0x158   :  { %2228 = vmatprep.subr.bf16.mxu0 %v2869_v10  ;;  %2260 = vmatprep.subr.bf16.mxu1 %v2871_v11 }
 0x20d   :  { %v671_v13 = vpop.f32.mrb[2].mxu0  ;;  %v742_v14 = vpop.f32.mrb[2].mxu1 }
 0x20e   :  { %v2573_v16 = vadd.f32 %v671_v13, %v3057_v6  ;;  %v673_v18 = vpop.f32.mrb[3].mxu0  ;;  %v744_v20 = vpop.f32.mrb[3].mxu1  ;;  %v2589_v38 = vadd.f32 %v742_v14, %v3066_v34 }
 0x20f   :  { %v2574_v22 = vadd.f32 %v673_v18, %v3059_v8  ;;  %v2590_v31 = vadd.f32 %v744_v20, %v3063_v29 }
 0x210   :  { %v1961_v25 = vmul.f32 -1.442695, %v2573_v16 }
 0x211   :  { %v1962_v27 = vmul.f32 -1.442695, %v2574_v22  ;;  %v1963_v33 = vmul.f32 -1.442695, %v2590_v31 }
 0x212   :  { %2657 = vpow2.f32 %v1961_v25 }
 0x213   :  { %2659 = vpow2.f32 %v1962_v27 }
 0x214   :  { %2661 = vpow2.f32 %v1963_v33 }
 0x215   :  { %2663 = vtanh.f32 %v2589_v38 }
 0x21c   :  { %v2658_v39 = vpop.eup %2657 }
 0x21d   :  { %v2660_v42 = vpop.eup %2659  ;;  %v754_v43 = vadd.f32 1.0, %v2658_v39 }
 0x21e   :  { %v760_v46 = vadd.f32 1.0, %v2660_v42  ;;  %v2662_v47 = vpop.eup %2661 }
 0x21f   :  { %2665 = vrcp.f32 %v754_v43  ;;  %v2664_v50 = vpop.eup %2663  ;;  %v767_v57 = vadd.f32 1.0, %v2662_v47 }
 0x220   :  { %2667 = vrcp.f32 %v760_v46 }
 0x221   :  { %2669 = vrcp.f32 %v767_v57 }
 0x229   :  { %v2666_v51 = vpop.eup %2665 }
 0x22a   :  { %v2668_v52 = vpop.eup %2667  ;;  %v771_v55 = vmul.f32 %v2666_v51, %v2664_v50 }
 0x22b   :  { %v770_v62 = vmul.f32 %v2668_v52, %v3069_v2  ;;  %v2670_v3 = vpop.eup %2669 }
 0x22d   :  { %v3111_v63 = vadd.f32 %v771_v55, %v770_v62 }
 0x22f   :  { %2671 = vtanh.f32 %v3111_v63 }
 0x239   :  { %v2672_v5 = vpop.eup %2671 }
 0x23a   :  { %v774_v9 = vmul.f32 %v2672_v5, %v2670_v3 }
 0x23c   :  { %845 = vmatmul.mubr.f32.vlgmr.msra.gmra.mrb[4].mxu0 %v774_v9  ;;  %916 = vmatmul.mubr.f32.vlgmr.msra.gmra.mrb[4].mxu1 %v774_v9 }
 0x23d   :  { %2230 = vmatpush1.bf16.msra.mxu0 %v2873_v15  ;;  %2262 = vmatpush1.bf16.msra.mxu1 %v2882_v19 }
 0x23e   :  { %2232 = vmatprep.subr.bf16.mxu0 %v2885_v23  ;;  %2264 = vmatprep.subr.bf16.mxu1 %v2887_v24 }
 0x23f   :  { %1019 = vmatprep.mubr.f32.mxu0 %v2800_v0  ;;  %1090 = vmatprep.mubr.f32.mxu1 %v2800_v0 }
 0x241   :  { %2234 = vmatpush1.bf16.msra.mxu0 %v2891_v28  ;;  %2266 = vmatpush1.bf16.msra.mxu1 %v2898_v32 }
 0x242   :  { %2236 = vmatprep.subr.bf16.mxu0 %v2902_v36  ;;  %2268 = vmatprep.subr.bf16.mxu1 %v2904_v37 }
 0x245   :  { %2238 = vmatpush1.bf16.msra.mxu0 %v2908_v41  ;;  %2270 = vmatpush1.bf16.msra.mxu1 %v2915_v45 }
 0x246   :  { %2240 = vmatprep.subr.bf16.mxu0 %v2919_v49  ;;  %2272 = vmatprep.subr.bf16.mxu1 %v2923_v53 }
 0x249   :  { %2242 = vmatpush1.bf16.msra.mxu0 %v2927_v56  ;;  %2274 = vmatpush1.bf16.msra.mxu1 %v2931_v60 }
 0x24a   :  { %2244 = vmatprep.subr.bf16.mxu0 %v2938_v1  ;;  %2276 = vmatprep.subr.bf16.mxu1 %v2942_v4 }
 0x24d   :  { %2246 = vmatpush1.bf16.msra.mxu0 %v2946_v7  ;;  %2278 = vmatpush1.bf16.msra.mxu1 %v2950_v12 }
 0x24e   :  { %2248 = vmatprep.subr.bf16.mxu0 %v2957_v17  ;;  %2280 = vmatprep.subr.bf16.mxu1 %v2961_v21 }
 0x251   :  { %2250 = vmatpush1.bf16.msra.mxu0 %v2965_v26  ;;  %2282 = vmatpush1.bf16.msra.mxu1 %v2969_v30 }
 0x252   :  { %2252 = vmatprep.subr.bf16.mxu0 %v2976_v35  ;;  %2284 = vmatprep.subr.bf16.mxu1 %v2980_v40 }
 0x255   :  { %2254 = vmatpush1.bf16.msra.mxu0 %v2984_v44  ;;  %2286 = vmatpush1.bf16.msra.mxu1 %v2988_v48 }
 0x256   :  { %2256 = vmatprep.subr.bf16.mxu0 %v2995_v54  ;;  %2288 = vmatprep.subr.bf16.mxu1 %v2999_v58 }
 0x259   :  { %2258 = vmatpush1.bf16.msra.mxu0 %v3003_v59  ;;  %2290 = vmatpush1.bf16.msra.mxu1 %v3007_v61 }
 0x25a   :  { %2292 = vmatprep.subr.bf16.mxu0 %v2869_v10  ;;  %2324 = vmatprep.subr.bf16.mxu1 %v2871_v11 }
 0x30f   :  { %v846_v2 = vpop.f32.mrb[4].mxu0  ;;  %v917_v13 = vpop.f32.mrb[4].mxu1 }
 0x310   :  { %v2575_v14 = vadd.f32 %v846_v2, %v3057_v6  ;;  %v848_v16 = vpop.f32.mrb[5].mxu0  ;;  %v919_v18 = vpop.f32.mrb[5].mxu1  ;;  %v2591_v33 = vadd.f32 %v917_v13, %v3066_v34 }
 0x311   :  { %v2576_v20 = vadd.f32 %v848_v16, %v3059_v8  ;;  %v2592_v27 = vadd.f32 %v919_v18, %v3063_v29 }
 0x312   :  { %v1964_v22 = vmul.f32 -1.442695, %v2575_v14 }
 0x313   :  { %v1965_v25 = vmul.f32 -1.442695, %v2576_v20  ;;  %v1966_v31 = vmul.f32 -1.442695, %v2592_v27 }
 0x314   :  { %2673 = vpow2.f32 %v1964_v22 }
 0x315   :  { %2675 = vpow2.f32 %v1965_v25 }
 0x316   :  { %2677 = vpow2.f32 %v1966_v31 }
 0x317   :  { %2679 = vtanh.f32 %v2591_v33 }
 0x31e   :  { %v2674_v38 = vpop.eup %2673 }
 0x31f   :  { %v2676_v39 = vpop.eup %2675  ;;  %v929_v42 = vadd.f32 1.0, %v2674_v38 }
 0x320   :  { %v935_v43 = vadd.f32 1.0, %v2676_v39  ;;  %v2678_v46 = vpop.eup %2677 }
 0x321   :  { %2681 = vrcp.f32 %v929_v42  ;;  %v2680_v47 = vpop.eup %2679  ;;  %v942_v55 = vadd.f32 1.0, %v2678_v46 }
 0x322   :  { %2683 = vrcp.f32 %v935_v43 }
 0x323   :  { %2685 = vrcp.f32 %v942_v55 }
 0x32b   :  { %v2682_v50 = vpop.eup %2681 }
 0x32c   :  { %v2684_v51 = vpop.eup %2683  ;;  %v946_v52 = vmul.f32 %v2682_v50, %v2680_v47 }
 0x32d   :  { %v945_v57 = vmul.f32 %v2684_v51, %v3111_v63  ;;  %v2686_v3 = vpop.eup %2685 }
 0x32f   :  { %v3153_v62 = vadd.f32 %v946_v52, %v945_v57 }
 0x331   :  { %2687 = vtanh.f32 %v3153_v62 }
 0x33b   :  { %v2688_v5 = vpop.eup %2687 }
 0x33c   :  { %v949_v9 = vmul.f32 %v2688_v5, %v2686_v3 }
 0x33e   :  { %1020 = vmatmul.mubr.f32.vlgmr.msra.gmra.mrb[6].mxu0 %v949_v9  ;;  %1091 = vmatmul.mubr.f32.vlgmr.msra.gmra.mrb[6].mxu1 %v949_v9 }
 0x33f   :  { %2294 = vmatpush1.bf16.msra.mxu0 %v2873_v15  ;;  %2326 = vmatpush1.bf16.msra.mxu1 %v2882_v19 }
 0x340   :  { %2296 = vmatprep.subr.bf16.mxu0 %v2885_v23  ;;  %2328 = vmatprep.subr.bf16.mxu1 %v2887_v24 }
 0x341   :  { %1194 = vmatprep.mubr.f32.mxu0 %v2800_v0  ;;  %1265 = vmatprep.mubr.f32.mxu1 %v2800_v0 }
 0x343   :  { %2298 = vmatpush1.bf16.msra.mxu0 %v2891_v28  ;;  %2330 = vmatpush1.bf16.msra.mxu1 %v2898_v32 }
 0x344   :  { %2300 = vmatprep.subr.bf16.mxu0 %v2902_v36  ;;  %2332 = vmatprep.subr.bf16.mxu1 %v2904_v37 }
 0x347   :  { %2302 = vmatpush1.bf16.msra.mxu0 %v2908_v41  ;;  %2334 = vmatpush1.bf16.msra.mxu1 %v2915_v45 }
 0x348   :  { %2304 = vmatprep.subr.bf16.mxu0 %v2919_v49  ;;  %2336 = vmatprep.subr.bf16.mxu1 %v2923_v53 }
 0x34b   :  { %2306 = vmatpush1.bf16.msra.mxu0 %v2927_v56  ;;  %2338 = vmatpush1.bf16.msra.mxu1 %v2931_v60 }
 0x34c   :  { %2308 = vmatprep.subr.bf16.mxu0 %v2938_v1  ;;  %2340 = vmatprep.subr.bf16.mxu1 %v2942_v4 }
 0x34f   :  { %2310 = vmatpush1.bf16.msra.mxu0 %v2946_v7  ;;  %2342 = vmatpush1.bf16.msra.mxu1 %v2950_v12 }
 0x350   :  { %2312 = vmatprep.subr.bf16.mxu0 %v2957_v17  ;;  %2344 = vmatprep.subr.bf16.mxu1 %v2961_v21 }
 0x353   :  { %2314 = vmatpush1.bf16.msra.mxu0 %v2965_v26  ;;  %2346 = vmatpush1.bf16.msra.mxu1 %v2969_v30 }
 0x354   :  { %2316 = vmatprep.subr.bf16.mxu0 %v2976_v35  ;;  %2348 = vmatprep.subr.bf16.mxu1 %v2980_v40 }
 0x357   :  { %2318 = vmatpush1.bf16.msra.mxu0 %v2984_v44  ;;  %2350 = vmatpush1.bf16.msra.mxu1 %v2988_v48 }
 0x358   :  { %2320 = vmatprep.subr.bf16.mxu0 %v2995_v54  ;;  %2352 = vmatprep.subr.bf16.mxu1 %v2999_v58 }
 0x35b   :  { %2322 = vmatpush1.bf16.msra.mxu0 %v3003_v59  ;;  %2354 = vmatpush1.bf16.msra.mxu1 %v3007_v61 }
 0x35c   :  { %2356 = vmatprep.subr.bf16.mxu0 %v2869_v10  ;;  %2388 = vmatprep.subr.bf16.mxu1 %v2871_v11 }
 0x411   :  { %v1021_v63 = vpop.f32.mrb[6].mxu0  ;;  %v1092_v2 = vpop.f32.mrb[6].mxu1 }
 0x412   :  { %v2577_v13 = vadd.f32 %v1021_v63, %v3057_v6  ;;  %v1023_v14 = vpop.f32.mrb[7].mxu0  ;;  %v1094_v16 = vpop.f32.mrb[7].mxu1  ;;  %v2593_v31 = vadd.f32 %v1092_v2, %v3066_v34 }
 0x413   :  { %v2578_v18 = vadd.f32 %v1023_v14, %v3059_v8  ;;  %v2594_v25 = vadd.f32 %v1094_v16, %v3063_v29 }
 0x414   :  { %v1967_v20 = vmul.f32 -1.442695, %v2577_v13 }
 0x415   :  { %v1968_v22 = vmul.f32 -1.442695, %v2578_v18  ;;  %v1969_v27 = vmul.f32 -1.442695, %v2594_v25 }
 0x416   :  { %2689 = vpow2.f32 %v1967_v20 }
 0x417   :  { %2691 = vpow2.f32 %v1968_v22 }
 0x418   :  { %2693 = vpow2.f32 %v1969_v27 }
 0x419   :  { %2695 = vtanh.f32 %v2593_v31 }
 0x420   :  { %v2690_v33 = vpop.eup %2689 }
 0x421   :  { %v2692_v38 = vpop.eup %2691  ;;  %v1104_v39 = vadd.f32 1.0, %v2690_v33 }
 0x422   :  { %v1110_v42 = vadd.f32 1.0, %v2692_v38  ;;  %v2694_v43 = vpop.eup %2693 }
 0x423   :  { %2697 = vrcp.f32 %v1104_v39  ;;  %v2696_v46 = vpop.eup %2695  ;;  %v1117_v52 = vadd.f32 1.0, %v2694_v43 }
 0x424   :  { %2699 = vrcp.f32 %v1110_v42 }
 0x425   :  { %2701 = vrcp.f32 %v1117_v52 }
 0x42d   :  { %v2698_v47 = vpop.eup %2697 }
 0x42e   :  { %v2700_v50 = vpop.eup %2699  ;;  %v1121_v51 = vmul.f32 %v2698_v47, %v2696_v46 }
 0x42f   :  { %v1120_v55 = vmul.f32 %v2700_v50, %v3153_v62  ;;  %v2702_v3 = vpop.eup %2701 }
 0x431   :  { %v3195_v57 = vadd.f32 %v1121_v51, %v1120_v55 }
 0x433   :  { %2703 = vtanh.f32 %v3195_v57 }
 0x43d   :  { %v2704_v5 = vpop.eup %2703 }
 0x43e   :  { %v1124_v9 = vmul.f32 %v2704_v5, %v2702_v3 }
 0x440   :  { %1195 = vmatmul.mubr.f32.vlgmr.msra.gmra.mrb[8].mxu0 %v1124_v9  ;;  %1266 = vmatmul.mubr.f32.vlgmr.msra.gmra.mrb[8].mxu1 %v1124_v9 }
 0x441   :  { %2358 = vmatpush1.bf16.msra.mxu0 %v2873_v15  ;;  %2390 = vmatpush1.bf16.msra.mxu1 %v2882_v19 }
 0x442   :  { %2360 = vmatprep.subr.bf16.mxu0 %v2885_v23  ;;  %2392 = vmatprep.subr.bf16.mxu1 %v2887_v24 }
 0x443   :  { %1369 = vmatprep.mubr.f32.mxu0 %v2800_v0  ;;  %1440 = vmatprep.mubr.f32.mxu1 %v2800_v0 }
 0x445   :  { %2362 = vmatpush1.bf16.msra.mxu0 %v2891_v28  ;;  %2394 = vmatpush1.bf16.msra.mxu1 %v2898_v32 }
 0x446   :  { %2364 = vmatprep.subr.bf16.mxu0 %v2902_v36  ;;  %2396 = vmatprep.subr.bf16.mxu1 %v2904_v37 }
 0x449   :  { %2366 = vmatpush1.bf16.msra.mxu0 %v2908_v41  ;;  %2398 = vmatpush1.bf16.msra.mxu1 %v2915_v45 }
 0x44a   :  { %2368 = vmatprep.subr.bf16.mxu0 %v2919_v49  ;;  %2400 = vmatprep.subr.bf16.mxu1 %v2923_v53 }
 0x44d   :  { %2370 = vmatpush1.bf16.msra.mxu0 %v2927_v56  ;;  %2402 = vmatpush1.bf16.msra.mxu1 %v2931_v60 }
 0x44e   :  { %2372 = vmatprep.subr.bf16.mxu0 %v2938_v1  ;;  %2404 = vmatprep.subr.bf16.mxu1 %v2942_v4 }
 0x451   :  { %2374 = vmatpush1.bf16.msra.mxu0 %v2946_v7  ;;  %2406 = vmatpush1.bf16.msra.mxu1 %v2950_v12 }
 0x452   :  { %2376 = vmatprep.subr.bf16.mxu0 %v2957_v17  ;;  %2408 = vmatprep.subr.bf16.mxu1 %v2961_v21 }
 0x455   :  { %2378 = vmatpush1.bf16.msra.mxu0 %v2965_v26  ;;  %2410 = vmatpush1.bf16.msra.mxu1 %v2969_v30 }
 0x456   :  { %2380 = vmatprep.subr.bf16.mxu0 %v2976_v35  ;;  %2412 = vmatprep.subr.bf16.mxu1 %v2980_v40 }
 0x459   :  { %2382 = vmatpush1.bf16.msra.mxu0 %v2984_v44  ;;  %2414 = vmatpush1.bf16.msra.mxu1 %v2988_v48 }
 0x45a   :  { %2384 = vmatprep.subr.bf16.mxu0 %v2995_v54  ;;  %2416 = vmatprep.subr.bf16.mxu1 %v2999_v58 }
 0x45d   :  { %2386 = vmatpush1.bf16.msra.mxu0 %v3003_v59  ;;  %2418 = vmatpush1.bf16.msra.mxu1 %v3007_v61 }
 0x45e   :  { %2420 = vmatprep.subr.bf16.mxu0 %v2869_v10  ;;  %2452 = vmatprep.subr.bf16.mxu1 %v2871_v11 }
 0x513   :  { %v1196_v62 = vpop.f32.mrb[8].mxu0  ;;  %v1267_v63 = vpop.f32.mrb[8].mxu1 }
 0x514   :  { %v2579_v2 = vadd.f32 %v1196_v62, %v3057_v6  ;;  %v1198_v13 = vpop.f32.mrb[9].mxu0  ;;  %v1269_v14 = vpop.f32.mrb[9].mxu1  ;;  %v2595_v27 = vadd.f32 %v1267_v63, %v3066_v34 }
 0x515   :  { %v2580_v16 = vadd.f32 %v1198_v13, %v3059_v8  ;;  %v2596_v22 = vadd.f32 %v1269_v14, %v3063_v29 }
 0x516   :  { %v1970_v18 = vmul.f32 -1.442695, %v2579_v2 }
 0x517   :  { %v1971_v20 = vmul.f32 -1.442695, %v2580_v16  ;;  %v1972_v25 = vmul.f32 -1.442695, %v2596_v22 }
 0x518   :  { %2705 = vpow2.f32 %v1970_v18 }
 0x519   :  { %2707 = vpow2.f32 %v1971_v20 }
 0x51a   :  { %2709 = vpow2.f32 %v1972_v25 }
 0x51b   :  { %2711 = vtanh.f32 %v2595_v27 }
 0x522   :  { %v2706_v31 = vpop.eup %2705 }
 0x523   :  { %v2708_v33 = vpop.eup %2707  ;;  %v1279_v38 = vadd.f32 1.0, %v2706_v31 }
 0x524   :  { %v1285_v39 = vadd.f32 1.0, %v2708_v33  ;;  %v2710_v42 = vpop.eup %2709 }
 0x525   :  { %2713 = vrcp.f32 %v1279_v38  ;;  %v2712_v43 = vpop.eup %2711  ;;  %v1292_v51 = vadd.f32 1.0, %v2710_v42 }
 0x526   :  { %2715 = vrcp.f32 %v1285_v39 }
 0x527   :  { %2717 = vrcp.f32 %v1292_v51 }
 0x52f   :  { %v2714_v46 = vpop.eup %2713 }
 0x530   :  { %v2716_v47 = vpop.eup %2715  ;;  %v1296_v50 = vmul.f32 %v2714_v46, %v2712_v43 }
 0x531   :  { %v1295_v52 = vmul.f32 %v2716_v47, %v3195_v57  ;;  %v2718_v3 = vpop.eup %2717 }
 0x533   :  { %v3237_v55 = vadd.f32 %v1296_v50, %v1295_v52 }
 0x535   :  { %2719 = vtanh.f32 %v3237_v55 }
 0x53f   :  { %v2720_v5 = vpop.eup %2719 }
 0x540   :  { %v1299_v9 = vmul.f32 %v2720_v5, %v2718_v3  ;;  %v1833_v5 = vld [vmem:[%s3389_s4 + $0x18] sm:$0xff] }
 0x542   :  { %1370 = vmatmul.mubr.f32.vlgmr.msra.gmra.mrb[10].mxu0 %v1299_v9  ;;  %1441 = vmatmul.mubr.f32.vlgmr.msra.gmra.mrb[10].mxu1 %v1299_v9 }
 0x543   :  { %2422 = vmatpush1.bf16.msra.mxu0 %v2873_v15  ;;  %2454 = vmatpush1.bf16.msra.mxu1 %v2882_v19 }
 0x544   :  { %2424 = vmatprep.subr.bf16.mxu0 %v2885_v23  ;;  %2456 = vmatprep.subr.bf16.mxu1 %v2887_v24 }
 0x545   :  { %1544 = vmatprep.mubr.f32.mxu0 %v2800_v0  ;;  %1615 = vmatprep.mubr.f32.mxu1 %v2800_v0 }
 0x547   :  { %2426 = vmatpush1.bf16.msra.mxu0 %v2891_v28  ;;  %2458 = vmatpush1.bf16.msra.mxu1 %v2898_v32 }
 0x548   :  { %2428 = vmatprep.subr.bf16.mxu0 %v2902_v36  ;;  %2460 = vmatprep.subr.bf16.mxu1 %v2904_v37 }
 0x54b   :  { %2430 = vmatpush1.bf16.msra.mxu0 %v2908_v41  ;;  %2462 = vmatpush1.bf16.msra.mxu1 %v2915_v45 }
 0x54c   :  { %2432 = vmatprep.subr.bf16.mxu0 %v2919_v49  ;;  %2464 = vmatprep.subr.bf16.mxu1 %v2923_v53 }
 0x54f   :  { %2434 = vmatpush1.bf16.msra.mxu0 %v2927_v56  ;;  %2466 = vmatpush1.bf16.msra.mxu1 %v2931_v60 }
 0x550   :  { %2436 = vmatprep.subr.bf16.mxu0 %v2938_v1  ;;  %2468 = vmatprep.subr.bf16.mxu1 %v2942_v4 }
 0x553   :  { %2438 = vmatpush1.bf16.msra.mxu0 %v2946_v7  ;;  %2470 = vmatpush1.bf16.msra.mxu1 %v2950_v12 }
 0x554   :  { %2440 = vmatprep.subr.bf16.mxu0 %v2957_v17  ;;  %2472 = vmatprep.subr.bf16.mxu1 %v2961_v21 }
 0x557   :  { %2442 = vmatpush1.bf16.msra.mxu0 %v2965_v26  ;;  %2474 = vmatpush1.bf16.msra.mxu1 %v2969_v30 }
 0x558   :  { %2444 = vmatprep.subr.bf16.mxu0 %v2976_v35  ;;  %2476 = vmatprep.subr.bf16.mxu1 %v2980_v40 }
 0x55b   :  { %2446 = vmatpush1.bf16.msra.mxu0 %v2984_v44  ;;  %2478 = vmatpush1.bf16.msra.mxu1 %v2988_v48 }
 0x55c   :  { %2448 = vmatprep.subr.bf16.mxu0 %v2995_v54  ;;  %2480 = vmatprep.subr.bf16.mxu1 %v2999_v58 }
 0x55f   :  { %2450 = vmatpush1.bf16.msra.mxu0 %v3003_v59  ;;  %2482 = vmatpush1.bf16.msra.mxu1 %v3007_v61 }
 0x560   :  { %2484 = vmatprep.subr.bf16.mxu0 %v2869_v10  ;;  %2516 = vmatprep.subr.bf16.mxu1 %v2871_v11 }
 0x615   :  { %v1371_v57 = vpop.f32.mrb[10].mxu0  ;;  %v1442_v62 = vpop.f32.mrb[10].mxu1 }
 0x616   :  { %v2581_v63 = vadd.f32 %v1371_v57, %v3057_v6  ;;  %v1373_v2 = vpop.f32.mrb[11].mxu0  ;;  %v1444_v13 = vpop.f32.mrb[11].mxu1  ;;  %v2597_v25 = vadd.f32 %v1442_v62, %v3066_v34  ;;  %v1834_v57 = vld [vmem:[%s3389_s4 + $0x20] sm:$0xff]  ;;  %v1835_v62 = vld [vmem:[%s3389_s4 + $0x28] sm:$0xff] }
 0x617   :  { %v2582_v14 = vadd.f32 %v1373_v2, %v3059_v8  ;;  %v2598_v20 = vadd.f32 %v1444_v13, %v3063_v29  ;;  %v1836_v2 = vld [vmem:[%s3389_s4 + $0x30] sm:$0xff]  ;;  %v1837_v13 = vld [vmem:[%s3389_s4 + $0x38] sm:$0xff] }
 0x618   :  { %v1973_v16 = vmul.f32 -1.442695, %v2581_v63  ;;  %v2554_v63 = vpack.c.bf16 %v1835_v62, %v1834_v57 }
 0x619   :  { %v1974_v18 = vmul.f32 -1.442695, %v2582_v14  ;;  %v1975_v22 = vmul.f32 -1.442695, %v2598_v20  ;;  %v2557_v14 = vpack.c.bf16 %v1837_v13, %v1836_v2 }
 0x61a   :  { %2721 = vpow2.f32 %v1973_v16  ;;  %v1838_v16 = vld [vmem:[%s3389_s4 + $0x40] sm:$0xff] }
 0x61b   :  { %2723 = vpow2.f32 %v1974_v18  ;;  %v1839_v18 = vld [vmem:[%s3389_s4 + $0x48] sm:$0xff] }
 0x61c   :  { %2725 = vpow2.f32 %v1975_v22  ;;  %v2560_v20 = vpack.c.bf16 %v1839_v18, %v1838_v16  ;;  %v1840_v22 = vld [vmem:[%s3389_s4 + $0x50] sm:$0xff] }
 0x61d   :  { %2727 = vtanh.f32 %v2597_v25  ;;  %v1841_v25 = vld [vmem:[%s3389_s4 + $0x58] sm:$0xff] }
 0x624   :  { %v2722_v10 = vpop.eup %2721 }
 0x625   :  { %v2724_v27 = vpop.eup %2723  ;;  %v1454_v11 = vadd.f32 1.0, %v2722_v10  ;;  %v1842_v10 = vld [vmem:[%s3389_s4 + $0x60] sm:$0xff] }
 0x626   :  { %v1460_v31 = vadd.f32 1.0, %v2724_v27  ;;  %v2726_v33 = vpop.eup %2725  ;;  %v2563_v27 = vpack.c.bf16 %v1841_v25, %v1840_v22 }
 0x627   :  { %2729 = vrcp.f32 %v1454_v11  ;;  %v2728_v38 = vpop.eup %2727  ;;  %v1467_v46 = vadd.f32 1.0, %v2726_v33  ;;  %v1843_v11 = vld [vmem:[%s3389_s4 + $0x68] sm:$0xff]  ;;  %v1844_v33 = vld [vmem:[%s3389_s4 + $0x70] sm:$0xff] }
 0x628   :  { %2731 = vrcp.f32 %v1460_v31  ;;  %v2566_v31 = vpack.c.bf16 %v1843_v11, %v1842_v10 }
 0x629   :  { %2733 = vrcp.f32 %v1467_v46 }
 0x631   :  { %v2730_v39 = vpop.eup %2729 }
 0x632   :  { %v2732_v42 = vpop.eup %2731  ;;  %v1471_v43 = vmul.f32 %v2730_v39, %v2728_v38  ;;  %v1845_v38 = vld [vmem:[%s3389_s4 + $0x78] sm:$0xff] }
 0x633   :  { %v1470_v47 = vmul.f32 %v2732_v42, %v3237_v55  ;;  %v2734_v51 = vpop.eup %2733  ;;  %v1832_v55 = vld [vmem:[%s3389_s4 + $0x10] sm:$0xff]  ;;  %v2569_v39 = vpack.c.bf16 %v1845_v38, %v1844_v33 }
 0x634   :  { %v2551_v9 = vpack.c.bf16 %v1833_v5, %v1832_v55 }
 0x635   :  { %v3279_v50 = vadd.f32 %v1471_v43, %v1470_v47 }
 0x637   :  { %2735 = vtanh.f32 %v3279_v50 }
 0x641   :  { %v2736_v52 = vpop.eup %2735 }
 0x642   :  { %v1474_v3 = vmul.f32 %v2736_v52, %v2734_v51 }
 0x644   :  { %1545 = vmatmul.mubr.f32.vlgmr.msra.gmra.mrb[12].mxu0 %v1474_v3  ;;  %1616 = vmatmul.mubr.f32.vlgmr.msra.gmra.mrb[12].mxu1 %v1474_v3 }
 0x645   :  { %2486 = vmatpush1.bf16.msra.mxu0 %v2873_v15  ;;  %2518 = vmatpush1.bf16.msra.mxu1 %v2882_v19 }
 0x646   :  { %2488 = vmatprep.subr.bf16.mxu0 %v2885_v23  ;;  %2520 = vmatprep.subr.bf16.mxu1 %v2887_v24 }
 0x647   :  { %1719 = vmatprep.mubr.f32.mxu0 %v2800_v0  ;;  %1790 = vmatprep.mubr.f32.mxu1 %v2800_v0 }
 0x649   :  { %2490 = vmatpush1.bf16.msra.mxu0 %v2891_v28  ;;  %2522 = vmatpush1.bf16.msra.mxu1 %v2898_v32 }
 0x64a   :  { %2492 = vmatprep.subr.bf16.mxu0 %v2902_v36  ;;  %2524 = vmatprep.subr.bf16.mxu1 %v2904_v37 }
 0x64d   :  { %2494 = vmatpush1.bf16.msra.mxu0 %v2908_v41  ;;  %2526 = vmatpush1.bf16.msra.mxu1 %v2915_v45 }
 0x64e   :  { %2496 = vmatprep.subr.bf16.mxu0 %v2919_v49  ;;  %2528 = vmatprep.subr.bf16.mxu1 %v2923_v53 }
 0x651   :  { %2498 = vmatpush1.bf16.msra.mxu0 %v2927_v56  ;;  %2530 = vmatpush1.bf16.msra.mxu1 %v2931_v60 }
 0x652   :  { %2500 = vmatprep.subr.bf16.mxu0 %v2938_v1  ;;  %2532 = vmatprep.subr.bf16.mxu1 %v2942_v4 }
 0x655   :  { %2502 = vmatpush1.bf16.msra.mxu0 %v2946_v7  ;;  %2534 = vmatpush1.bf16.msra.mxu1 %v2950_v12 }
 0x656   :  { %2504 = vmatprep.subr.bf16.mxu0 %v2957_v17  ;;  %2536 = vmatprep.subr.bf16.mxu1 %v2961_v21 }
 0x659   :  { %2506 = vmatpush1.bf16.msra.mxu0 %v2965_v26  ;;  %2538 = vmatpush1.bf16.msra.mxu1 %v2969_v30 }
 0x65a   :  { %2508 = vmatprep.subr.bf16.mxu0 %v2976_v35  ;;  %2540 = vmatprep.subr.bf16.mxu1 %v2980_v40 }
 0x65d   :  { %2510 = vmatpush1.bf16.msra.mxu0 %v2984_v44  ;;  %2542 = vmatpush1.bf16.msra.mxu1 %v2988_v48 }
 0x65e   :  { %2512 = vmatprep.subr.bf16.mxu0 %v2995_v54  ;;  %2544 = vmatprep.subr.bf16.mxu1 %v2999_v58  ;;  %v1830_v54 = vld [vmem:[%s3389_s4] sm:$0xff]  ;;  %v1831_v58 = vld [vmem:[%s3389_s4 + $0x8] sm:$0xff] }
 0x661   :  { %2514 = vmatpush1.bf16.msra.mxu0 %v3003_v59  ;;  %2546 = vmatpush1.bf16.msra.mxu1 %v3007_v61  ;;  %v2548_v59 = vpack.c.bf16 %v1831_v58, %v1830_v54  ;;  %v2801_v61 = vmov 0.0|0.0  }
 0x662   :  { %2547 = vmatprep.subr.bf16.mxu0 %v2801_v61 }
 0x717   :  { %v1546_v15 = vpop.f32.mrb[12].mxu0  ;;  %v1617_v19 = vpop.f32.mrb[12].mxu1 }
 0x718   :  { %v2583_v23 = vadd.f32 %v1546_v15, %v3057_v6  ;;  %v1548_v24 = vpop.f32.mrb[13].mxu0  ;;  %v1619_v28 = vpop.f32.mrb[13].mxu1  ;;  %v2599_v49 = vadd.f32 %v1617_v19, %v3066_v34 }
 0x719   :  { %v2584_v32 = vadd.f32 %v1548_v24, %v3059_v8  ;;  %v2600_v41 = vadd.f32 %v1619_v28, %v3063_v29 }
 0x71a   :  { %v1976_v36 = vmul.f32 -1.442695, %v2583_v23 }
 0x71b   :  { %v1977_v37 = vmul.f32 -1.442695, %v2584_v32  ;;  %v1978_v45 = vmul.f32 -1.442695, %v2600_v41 }
 0x71c   :  { %2737 = vpow2.f32 %v1976_v36 }
 0x71d   :  { %2739 = vpow2.f32 %v1977_v37 }
 0x71e   :  { %2741 = vpow2.f32 %v1978_v45 }
 0x71f   :  { %2743 = vtanh.f32 %v2599_v49 }
 0x726   :  { %v2738_v53 = vpop.eup %2737 }
 0x727   :  { %v2740_v56 = vpop.eup %2739  ;;  %v1629_v60 = vadd.f32 1.0, %v2738_v53 }
 0x728   :  { %v1635_v1 = vadd.f32 1.0, %v2740_v56  ;;  %v2742_v4 = vpop.eup %2741 }
 0x729   :  { %2745 = vrcp.f32 %v1629_v60  ;;  %v2744_v7 = vpop.eup %2743  ;;  %v1642_v26 = vadd.f32 1.0, %v2742_v4  ;;  %v1982_v60 = vld [vmem:[%s3390_s5] ss:$0 sm:$0xff] }
 0x72a   :  { %2747 = vrcp.f32 %v1635_v1 }
 0x72b   :  { %2749 = vrcp.f32 %v1642_v26 }
 0x733   :  { %v2746_v12 = vpop.eup %2745 }
 0x734   :  { %v2748_v17 = vpop.eup %2747  ;;  %v1646_v21 = vmul.f32 %v2746_v12, %v2744_v7 }
 0x735   :  { %v1645_v30 = vmul.f32 %v2748_v17, %v3279_v50  ;;  %v2750_v40 = vpop.eup %2749 }
 0x737   :  { %v3319_v35 = vadd.f32 %v1646_v21, %v1645_v30 }
 0x739   :  { %2751 = vtanh.f32 %v3319_v35 }
 0x743   :  { %v2752_v44 = vpop.eup %2751 }
 0x744   :  { %v1649_v48 = vmul.f32 %v2752_v44, %v2750_v40 }
 0x746   :  { %1720 = vmatmul.mubr.f32.vlgmr.msra.gmra.mrb[14].mxu0 %v1649_v48  ;;  %1791 = vmatmul.mubr.f32.vlgmr.msra.gmra.mrb[14].mxu1 %v1649_v48 }
 0x747   :  { %2549 = vmatpush3.bf16.msra.mxu0 %v2548_v59  ;;  %2032 = vmatprep.mubr.msk.f32.mxu0 %vm2802_vm1, %v2800_v0 }
 0x748   :  { %2550 = vmatprep.subr.bf16.mxu0 %v2801_v61 }
 0x74b   :  { %2552 = vmatpush3.bf16.msra.mxu0 %v2551_v9 }
 0x74c   :  { %2553 = vmatprep.subr.bf16.mxu0 %v2801_v61 }
 0x74f   :  { %2555 = vmatpush3.bf16.msra.mxu0 %v2554_v63 }
 0x750   :  { %2556 = vmatprep.subr.bf16.mxu0 %v2801_v61 }
 0x753   :  { %2558 = vmatpush3.bf16.msra.mxu0 %v2557_v14 }
 0x754   :  { %2559 = vmatprep.subr.bf16.mxu0 %v2801_v61 }
 0x757   :  { %2561 = vmatpush3.bf16.msra.mxu0 %v2560_v20 }
 0x758   :  { %2562 = vmatprep.subr.bf16.mxu0 %v2801_v61 }
 0x75b   :  { %2564 = vmatpush3.bf16.msra.mxu0 %v2563_v27 }
 0x75c   :  { %2565 = vmatprep.subr.bf16.mxu0 %v2801_v61 }
 0x75f   :  { %2567 = vmatpush3.bf16.msra.mxu0 %v2566_v31 }
 0x760   :  { %2568 = vmatprep.subr.bf16.mxu0 %v2801_v61 }
 0x763   :  { %2570 = vmatpush3.bf16.msra.mxu0 %v2569_v39 }
 0x819   :  { %v1721_v42 = vpop.f32.mrb[14].mxu0  ;;  %v1792_v43 = vpop.f32.mrb[14].mxu1 }
 0x81a   :  { %v2585_v46 = vadd.f32 %v1721_v42, %v3057_v6  ;;  %v1723_v0 = vpop.f32.mrb[15].mxu0  ;;  %v1794_v47 = vpop.f32.mrb[15].mxu1  ;;  %v2601_v19 = vadd.f32 %v1792_v43, %v3066_v34 }
 0x81b   :  { %v2586_v50 = vadd.f32 %v1723_v0, %v3059_v8  ;;  %v2602_v3 = vadd.f32 %v1794_v47, %v3063_v29 }
 0x81c   :  { %v1979_v51 = vmul.f32 -1.442695, %v2585_v46 }
 0x81d   :  { %v1980_v52 = vmul.f32 -1.442695, %v2586_v50  ;;  %v1981_v15 = vmul.f32 -1.442695, %v2602_v3 }
 0x81e   :  { %2753 = vpow2.f32 %v1979_v51 }
 0x81f   :  { %2755 = vpow2.f32 %v1980_v52 }
 0x820   :  { %2757 = vpow2.f32 %v1981_v15 }
 0x821   :  { %2759 = vtanh.f32 %v2601_v19 }
 0x828   :  { %v2754_v23 = vpop.eup %2753 }
 0x829   :  { %v2756_v24 = vpop.eup %2755  ;;  %v1804_v28 = vadd.f32 1.0, %v2754_v23 }
 0x82a   :  { %v1810_v32 = vadd.f32 1.0, %v2756_v24  ;;  %v2758_v6 = vpop.eup %2757 }
 0x82b   :  { %2761 = vrcp.f32 %v1804_v28  ;;  %v2760_v36 = vpop.eup %2759  ;;  %v1817_v45 = vadd.f32 1.0, %v2758_v6 }
 0x82c   :  { %2763 = vrcp.f32 %v1810_v32 }
 0x82d   :  { %2765 = vrcp.f32 %v1817_v45 }
 0x835   :  { %v2762_v8 = vpop.eup %2761 }
 0x836   :  { %v2764_v37 = vpop.eup %2763  ;;  %v1821_v41 = vmul.f32 %v2762_v8, %v2760_v36 }
 0x837   :  { %v1820_v49 = vmul.f32 %v2764_v37, %v3319_v35  ;;  %v2766_v34 = vpop.eup %2765 }
 0x839   :  { %v1822_v29 = vadd.f32 %v1821_v41, %v1820_v49 }
 0x83b   :  { %2767 = vtanh.f32 %v1822_v29 }
 0x845   :  { %v2768_v53 = vpop.eup %2767 }
 0x846   :  { %v1824_v56 = vmul.f32 %v2768_v53, %v2766_v34 }
 0x848   :  { %2033 = vmatmul.mubr.f32.vlgmr.msra.gmra.mrb[16].mxu0 %v1824_v56 }
 0x91b   :  { %v1919_v1 = vpop.f32.mrb[16].mxu0 }
 0x91c   :  { %v1920_v4 = vadd.f32 %v1982_v60, %v1919_v1  ;;  %v2034_v7 = vpop.f32.mrb[17].mxu0 }
 0x91e   :  { %v1924_v12 = vsel %vm1923_vm2, %v1920_v4, -inf }
 0x91f   :  { %1925 = vmax.xlane.f32.xlu0 %v1924_v12 }
 0x9ac   :  { %v1926_v17 = vpop.xlane.xlu0 %1925 }
 0x9ad   :  { %v1927_v21 = vsub.f32 %v1920_v4, %v1926_v17 }
 0x9af   :  { %v1928_v26 = vmul.f32 1.442695, %v1927_v21 }
 0x9b1   :  { %2769 = vpow2.f32 %v1928_v26 }
 0x9bb   :  { %v2770_v30 = vpop.eup %2769 }
 0x9bc   :  { %v1930_v35 = vsel %vm1923_vm2, %v2770_v30, 0.0 }
 0x9bd   :  { %1931 = vadd.xlane.f32.xlu0 %v1930_v35 }
 0xa4a   :  { %v1932_v40 = vpop.xlane.xlu0 %1931 }
 0xa4b   :  { %2771 = vlog2.f32 %v1932_v40 }
 0xa55   :  { %v2772_v44 = vpop.eup %2771 }
 0xa56   :  { %v1934_v48 = vmul.f32 0.6931472, %v2772_v44 }
 0xa58   :  { %v1935_v54 = vsub.f32 %v1927_v21, %v1934_v48 }
 0xa5a   :  { %1936 = vst.msk [vmem:[%s3391_s6] sm:$0xff] %vm1923_vm2, %v1935_v54 }
 0xa5b   :  { %1941 = vsyncpa [#allocation6], 1 }

</bundles_post_ra>
